<compile_context>
chip_gen: v5e
topology: v5e:2x2
jax: 0.10.0
libtpu: 0.0.40
codegen_flags: <defaults>
</compile_context>

<pallas_src>
import functools

import jax
import jax.numpy as jnp
from jax.experimental import pallas as pl
from jax.experimental.pallas import tpu as pltpu

_NEG_BIG = -1e30  # finite "minus infinity" so masked exp/max never produce NaN


def _round_up(x, m):
    return ((x + m - 1) // m) * m


def _instance_loss_kernel(ga_ref, la_ref, sa_ref, gb_ref, lb_ref, sb_ref,
                          za_ref, zct_ref, out_ref, m_sc, l_sc, p_sc,
                          *, inv_tau, n_rows_valid, inv_n_pos):
    j = pl.program_id(1)            # contrast-column tile (reduction axis)
    nj = pl.num_programs(1)

    @pl.when(j == 0)
    def _init():
        m_sc[...] = jnp.full_like(m_sc, _NEG_BIG)
        l_sc[...] = jnp.zeros_like(l_sc)
        p_sc[...] = jnp.zeros_like(p_sc)

    # (TR, TC) logits tile: anchor . contrast / tau.  Inputs stay in their
    # native dtype (bf16 hits the bf16 MXU path); accumulation is f32.
    s = jax.lax.dot_general(
        za_ref[...], zct_ref[...],
        (((1,), (0,)), ((), ())),
        preferred_element_type=jnp.float32) * inv_tau

    ga = ga_ref[...]                 # (TR, 1) global row index of anchor rows
    la = la_ref[...]                 # (TR, 1) pseudo label (invalid -> unique negative)
    sa = sa_ref[...]                 # (TR, 1) sample id of anchor rows
    gb = gb_ref[...]                 # (1, TC) global col index
    lb = lb_ref[...]                 # (1, TC) pseudo label of contrast cols
    sb = sb_ref[...]                 # (1, TC) sample id of contrast cols

    same_sample = sa == sb           # other view of the same image (or self)
    diff_label = la != lb            # NOT same-valid-pseudo-label (invalids are unique)
    not_self = ga != gb
    col_real = gb < n_rows_valid     # drop padded columns

    # "logits_mask" of the torch code: drop self and drop same-pseudo-label
    # pairs of *different* samples from the softmax denominator.
    denom_mask = ((same_sample | diff_label) & not_self) & col_real
    # "mask_eye * logits_mask": positives = other view(s) of the same sample.
    pos_mask = (same_sample & not_self) & col_real

    s_m = jnp.where(denom_mask, s, _NEG_BIG)
    tile_max = jnp.max(s_m, axis=1, keepdims=True)            # (TR, 1)
    m_prev = m_sc[...]
    m_new = jnp.maximum(m_prev, tile_max)
    alpha = jnp.exp(m_prev - m_new)
    p = jnp.exp(s_m - m_new)         # masked entries underflow to 0 once m_new is finite;
                                     # an all-masked prefix self-corrects via alpha -> 0.
    l_sc[...] = alpha * l_sc[...] + jnp.sum(p, axis=1, keepdims=True)
    p_sc[...] = p_sc[...] + jnp.sum(jnp.where(pos_mask, s, 0.0), axis=1, keepdims=True)
    m_sc[...] = m_new

    @pl.when(j == nj - 1)
    def _finish():
        mean_pos = p_sc[...] * inv_n_pos                       # mean log-numerator over positives
        row_loss = -(mean_pos - m_sc[...] - jnp.log(l_sc[...]))
        out_ref[...] = jnp.where(ga < n_rows_valid, row_loss, 0.0)


def instance_loss_boost(z, pseudo_label, *, tau=0.5, multiplier=2):
    """Forward of InstanceLossBoost (non-distributed path).

    z:            (multiplier * n, d) features, views stacked along rows
                  (rows [0, n) = view 0, rows [n, 2n) = view 1, ...).
    pseudo_label: (n,) int labels; -1 = no pseudo label.
    """
    # TODO(synk): distributed all_gather + per-rank chunk re-ordering path is
    # collective plumbing outside the kernel and is not implemented here.
    total, d = z.shape
    assert total % multiplier == 0 and multiplier >= 2
    n = total // multiplier
    assert pseudo_label.shape == (n,)

    TR = 128
    TC = min(512, _round_up(total, 128))     # TC is a multiple of 128
    P = _round_up(total, TC)                 # so TR=128 also divides P
    pad = P - total

    idx = jnp.arange(P, dtype=jnp.int32)
    valid = idx < total
    # Padded rows/cols get unique negative sample ids; invalid (-1) pseudo
    # labels get unique negative labels so "same valid label" is one compare.
    sample_id = jnp.where(valid, idx % n, -(idx + 2))
    labels = jnp.pad(jnp.tile(pseudo_label.astype(jnp.int32), (multiplier,)),
                     (0, pad), constant_values=-1)
    labels = jnp.where(labels >= 0, labels, -(idx + 2))

    z_p = jnp.pad(z, ((0, pad), (0, 0)))     # keep input dtype (bf16 halves DMA bytes)
    z_t = z_p.T                              # (d, P): canonical MXU RHS orientation

    ga = idx.reshape(P, 1)
    la = labels.reshape(P, 1)
    sa = sample_id.reshape(P, 1)
    gb = idx.reshape(1, P)
    lb = labels.reshape(1, P)
    sb = sample_id.reshape(1, P)

    kernel = functools.partial(
        _instance_loss_kernel,
        inv_tau=float(1.0 / tau),
        n_rows_valid=int(total),
        inv_n_pos=float(1.0 / (multiplier - 1)),
    )

    row_losses = pl.pallas_call(
        kernel,
        out_shape=jax.ShapeDtypeStruct((P, 1), jnp.float32),
        grid_spec=pltpu.PrefetchScalarGridSpec(
            num_scalar_prefetch=0,
            grid=(P // TR, P // TC),
            in_specs=[
                pl.BlockSpec((TR, 1), lambda i, j: (i, 0)),   # row global index
                pl.BlockSpec((TR, 1), lambda i, j: (i, 0)),   # row labels
                pl.BlockSpec((TR, 1), lambda i, j: (i, 0)),   # row sample ids
                pl.BlockSpec((1, TC), lambda i, j: (0, j)),   # col global index (lane-dense)
                pl.BlockSpec((1, TC), lambda i, j: (0, j)),   # col labels
                pl.BlockSpec((1, TC), lambda i, j: (0, j)),   # col sample ids
                pl.BlockSpec((TR, d), lambda i, j: (i, 0)),   # anchor rows (resident across j)
                pl.BlockSpec((d, TC), lambda i, j: (0, j)),   # contrast cols (streamed)
            ],
            out_specs=pl.BlockSpec((TR, 1), lambda i, j: (i, 0)),
            scratch_shapes=[pltpu.VMEM((TR, 1), jnp.float32)] * 3,  # m, l, pos
        ),
        compiler_params=pltpu.CompilerParams(
            dimension_semantics=("parallel", "arbitrary"),
            vmem_limit_bytes=32 * 1024 * 1024,
        ),
    )(ga, la, sa, gb, lb, sb, z_p, z_t)

    return jnp.sum(row_losses) / float(total)


def _reference(z, pseudo_label, tau, multiplier):
    """Pure-JAX mirror of the PyTorch forward (non-distributed)."""
    total = z.shape[0]
    n = total // multiplier
    invalid = pseudo_label == -1
    mask = pseudo_label[:, None] == pseudo_label[None, :]
    mask = mask & (~invalid[:, None]) & (~invalid[None, :])
    mask = mask & (~jnp.eye(n, dtype=bool))
    mask = mask.astype(jnp.float32)
    mask_eye = jnp.eye(n, dtype=jnp.float32)

    zf = z.astype(jnp.float32)
    anchor_dot_contrast = (zf @ zf.T) / tau
    logits_max = jnp.max(anchor_dot_contrast, axis=1, keepdims=True)
    logits = anchor_dot_contrast - logits_max

    mask_rep = jnp.tile(mask, (multiplier, multiplier))
    mask_eye_rep = jnp.tile(mask_eye, (multiplier, multiplier))
    logits_mask = 1.0 - jnp.eye(total, dtype=jnp.float32)
    logits_mask = logits_mask * (1.0 - mask_rep)
    mask_eye_rep = mask_eye_rep * logits_mask

    exp_logits = jnp.exp(logits) * logits_mask
    log_prob = logits - jnp.log(jnp.sum(exp_logits, axis=1, keepdims=True))
    mean_log_prob_pos = jnp.sum(mask_eye_rep * log_prob, axis=1) / jnp.sum(mask_eye_rep, axis=1)
    return jnp.mean(-mean_log_prob_pos)


if __name__ == "__main__":
    # TODO(synk): generate_pseudo_labels (host-side per-class argsort / loop
    # pseudo-label assignment, no_grad) is bookkeeping outside the forward hot
    # path and is not implemented as a kernel.
    n, d, cluster_num, multiplier, tau = 8, 32, 10, 2, 0.5

    key = jax.random.PRNGKey(0)
    k1, k2 = jax.random.split(key)
    z = jax.random.normal(k1, (multiplier * n, d), dtype=jnp.float32)
    z = z / jnp.linalg.norm(z, axis=1, keepdims=True)   # contrastive features are unit-norm
    z = z.astype(jnp.bfloat16)                          # features arrive bf16; bf16 MXU path
    pseudo_label = jax.random.randint(k2, (n,), -1, cluster_num, dtype=jnp.int32)

    loss = instance_loss_boost(z, pseudo_label, tau=tau, multiplier=multiplier)
    loss = jax.block_until_ready(loss)

    ref = _reference(z.astype(jnp.float32), pseudo_label, tau, multiplier)
    assert jnp.allclose(loss, ref, rtol=1e-4, atol=1e-4), (loss, ref)

    print("KERNEL_OK")
</pallas_src>

<mosaic_0001>
module attributes {stable_mosaic.version = 11 : i64} {
  func.func @_instance_loss_kernel(%arg0: i32, %arg1: i32, %arg2: memref<128x1xi32, #tpu.memory_space<vmem>>, %arg3: memref<128x1xi32, #tpu.memory_space<vmem>>, %arg4: memref<128x1xi32, #tpu.memory_space<vmem>>, %arg5: memref<1x128xi32, #tpu.memory_space<vmem>>, %arg6: memref<1x128xi32, #tpu.memory_space<vmem>>, %arg7: memref<1x128xi32, #tpu.memory_space<vmem>>, %arg8: memref<128x32xbf16, #tpu.memory_space<vmem>>, %arg9: memref<32x128xbf16, #tpu.memory_space<vmem>>, %arg10: memref<128x1xf32, #tpu.memory_space<vmem>>, %arg11: memref<128x1xf32, #tpu.memory_space<vmem>>, %arg12: memref<128x1xf32, #tpu.memory_space<vmem>>, %arg13: memref<128x1xf32, #tpu.memory_space<vmem>>) attributes {dimension_semantics = [#tpu.dimension_semantics<parallel>, #tpu.dimension_semantics<arbitrary>], iteration_bounds = array<i64: 1, 1>, scalar_prefetch = 0 : i64, scratch_operands = 3 : i64, tpu.core_type = #tpu.core_type<tc>, window_params = [{transform_indices = @transform_0, window_bounds = array<i64: 128, 1>}, {transform_indices = @transform_1, window_bounds = array<i64: 128, 1>}, {transform_indices = @transform_2, window_bounds = array<i64: 128, 1>}, {transform_indices = @transform_3, window_bounds = array<i64: 1, 128>}, {transform_indices = @transform_4, window_bounds = array<i64: 1, 128>}, {transform_indices = @transform_5, window_bounds = array<i64: 1, 128>}, {transform_indices = @transform_6, window_bounds = array<i64: 128, 32>}, {transform_indices = @transform_7, window_bounds = array<i64: 32, 128>}, {transform_indices = @transform_8, window_bounds = array<i64: 128, 1>}]} {
    %c0_i32 = arith.constant 0 : i32
    %0 = arith.cmpi eq, %arg1, %c0_i32 : i32
    %1 = arith.extui %0 : i1 to i32
    %c0_i32_0 = arith.constant 0 : i32
    %2 = arith.cmpi ne, %1, %c0_i32_0 : i32
    scf.if %2 {
      %cst_36 = arith.constant -1.000000e+30 : f32
      %60 = vector.broadcast %cst_36 : f32 to vector<128x1xf32>
      %c0_37 = arith.constant 0 : index
      %c0_38 = arith.constant 0 : index
      %61 = vector.load %arg11[%c0_37, %c0_38] : memref<128x1xf32, #tpu.memory_space<vmem>>, vector<128x1xf32>
      tpu.vector_store %arg11[%c0_37, %c0_38], %60 {strides = array<i32>} : memref<128x1xf32, #tpu.memory_space<vmem>>, vector<128x1xf32>,
      %cst_39 = arith.constant 0.000000e+00 : f32
      %62 = vector.broadcast %cst_39 : f32 to vector<128x1xf32>
      %c0_40 = arith.constant 0 : index
      %c0_41 = arith.constant 0 : index
      %63 = vector.load %arg12[%c0_40, %c0_41] : memref<128x1xf32, #tpu.memory_space<vmem>>, vector<128x1xf32>
      tpu.vector_store %arg12[%c0_40, %c0_41], %62 {strides = array<i32>} : memref<128x1xf32, #tpu.memory_space<vmem>>, vector<128x1xf32>,
      %cst_42 = arith.constant 0.000000e+00 : f32
      %64 = vector.broadcast %cst_42 : f32 to vector<128x1xf32>
      %c0_43 = arith.constant 0 : index
      %c0_44 = arith.constant 0 : index
      %65 = vector.load %arg13[%c0_43, %c0_44] : memref<128x1xf32, #tpu.memory_space<vmem>>, vector<128x1xf32>
      tpu.vector_store %arg13[%c0_43, %c0_44], %64 {strides = array<i32>} : memref<128x1xf32, #tpu.memory_space<vmem>>, vector<128x1xf32>,
    } else {
    }
    %c0 = arith.constant 0 : index
    %c0_1 = arith.constant 0 : index
    %3 = vector.load %arg8[%c0, %c0_1] : memref<128x32xbf16, #tpu.memory_space<vmem>>, vector<128x32xbf16>
    %c0_2 = arith.constant 0 : index
    %c0_3 = arith.constant 0 : index
    %4 = vector.load %arg9[%c0_2, %c0_3] : memref<32x128xbf16, #tpu.memory_space<vmem>>, vector<32x128xbf16>
    %cst = arith.constant dense<0.000000e+00> : vector<128x128xf32>
    %5 = tpu.matmul %3, %4, %cst {dimension_numbers = #tpu.dot_dimension_numbers<[1], [0], [0], [1], [0, 0, 1, 1], [], []>} : vector<128x32xbf16>, vector<32x128xbf16>, vector<128x128xf32> -> vector<128x128xf32>
    %cst_4 = arith.constant 2.000000e+00 : f32
    %6 = vector.broadcast %cst_4 : f32 to vector<128x128xf32>
    %7 = arith.mulf %5, %6 : vector<128x128xf32>
    %c0_5 = arith.constant 0 : index
    %c0_6 = arith.constant 0 : index
    %8 = vector.load %arg2[%c0_5, %c0_6] : memref<128x1xi32, #tpu.memory_space<vmem>>, vector<128x1xi32>
    %c0_7 = arith.constant 0 : index
    %c0_8 = arith.constant 0 : index
    %9 = vector.load %arg3[%c0_7, %c0_8] : memref<128x1xi32, #tpu.memory_space<vmem>>, vector<128x1xi32>
    %c0_9 = arith.constant 0 : index
    %c0_10 = arith.constant 0 : index
    %10 = vector.load %arg4[%c0_9, %c0_10] : memref<128x1xi32, #tpu.memory_space<vmem>>, vector<128x1xi32>
    %c0_11 = arith.constant 0 : index
    %c0_12 = arith.constant 0 : index
    %11 = vector.load %arg5[%c0_11, %c0_12] : memref<1x128xi32, #tpu.memory_space<vmem>>, vector<1x128xi32>
    %c0_13 = arith.constant 0 : index
    %c0_14 = arith.constant 0 : index
    %12 = vector.load %arg6[%c0_13, %c0_14] : memref<1x128xi32, #tpu.memory_space<vmem>>, vector<1x128xi32>
    %c0_15 = arith.constant 0 : index
    %c0_16 = arith.constant 0 : index
    %13 = vector.load %arg7[%c0_15, %c0_16] : memref<1x128xi32, #tpu.memory_space<vmem>>, vector<1x128xi32>
    %14 = vector.broadcast %10 : vector<128x1xi32> to vector<128x128xi32>
    %15 = vector.broadcast %13 : vector<1x128xi32> to vector<128x128xi32>
    %16 = arith.cmpi eq, %14, %15 : vector<128x128xi32>
    %17 = vector.broadcast %9 : vector<128x1xi32> to vector<128x128xi32>
    %18 = vector.broadcast %12 : vector<1x128xi32> to vector<128x128xi32>
    %19 = arith.cmpi ne, %17, %18 : vector<128x128xi32>
    %20 = vector.broadcast %8 : vector<128x1xi32> to vector<128x128xi32>
    %21 = vector.broadcast %11 : vector<1x128xi32> to vector<128x128xi32>
    %22 = arith.cmpi ne, %20, %21 : vector<128x128xi32>
    %c16_i32 = arith.constant 16 : i32
    %23 = vector.broadcast %c16_i32 : i32 to vector<1x128xi32>
    %24 = arith.cmpi slt, %11, %23 : vector<1x128xi32>
    %25 = arith.ori %16, %19 : vector<128x128xi1>
    %26 = arith.andi %25, %22 : vector<128x128xi1>
    %27 = vector.broadcast %24 : vector<1x128xi1> to vector<128x128xi1>
    %28 = arith.andi %26, %27 : vector<128x128xi1>
    %29 = arith.andi %16, %22 : vector<128x128xi1>
    %30 = vector.broadcast %24 : vector<1x128xi1> to vector<128x128xi1>
    %31 = arith.andi %29, %30 : vector<128x128xi1>
    %cst_17 = arith.constant -1.000000e+30 : f32
    %32 = vector.broadcast %cst_17 : f32 to vector<128x128xf32>
    %33 = arith.select %28, %7, %32 : vector<128x128xi1>, vector<128x128xf32>
    %cst_18 = arith.constant dense<0xFF800000> : vector<128xf32>
    %34 = vector.multi_reduction <maximumf>, %33, %cst_18 [1] : vector<128x128xf32> to vector<128xf32>
    %35 = vector.shape_cast %34 : vector<128xf32> to vector<128x1xf32>
    %c0_19 = arith.constant 0 : index
    %c0_20 = arith.constant 0 : index
    %36 = vector.load %arg11[%c0_19, %c0_20] : memref<128x1xf32, #tpu.memory_space<vmem>>, vector<128x1xf32>
    %37 = arith.maximumf %36, %35 : vector<128x1xf32>
    %38 = arith.subf %36, %37 : vector<128x1xf32>
    %39 = math.exp %38 : vector<128x1xf32>
    %40 = vector.broadcast %37 : vector<128x1xf32> to vector<128x128xf32>
    %41 = arith.subf %33, %40 : vector<128x128xf32>
    %42 = math.exp %41 : vector<128x128xf32>
    %c0_21 = arith.constant 0 : index
    %c0_22 = arith.constant 0 : index
    %43 = vector.load %arg12[%c0_21, %c0_22] : memref<128x1xf32, #tpu.memory_space<vmem>>, vector<128x1xf32>
    %44 = arith.mulf %39, %43 : vector<128x1xf32>
    %cst_23 = arith.constant dense<0.000000e+00> : vector<128xf32>
    %45 = vector.multi_reduction <add>, %42, %cst_23 [1] : vector<128x128xf32> to vector<128xf32>
    %46 = vector.shape_cast %45 : vector<128xf32> to vector<128x1xf32>
    %47 = arith.addf %44, %46 : vector<128x1xf32>
    %c0_24 = arith.constant 0 : index
    %c0_25 = arith.constant 0 : index
    %48 = vector.load %arg12[%c0_24, %c0_25] : memref<128x1xf32, #tpu.memory_space<vmem>>, vector<128x1xf32>
    tpu.vector_store %arg12[%c0_24, %c0_25], %47 {strides = array<i32>} : memref<128x1xf32, #tpu.memory_space<vmem>>, vector<128x1xf32>,
    %c0_26 = arith.constant 0 : index
    %c0_27 = arith.constant 0 : index
    %49 = vector.load %arg13[%c0_26, %c0_27] : memref<128x1xf32, #tpu.memory_space<vmem>>, vector<128x1xf32>
    %cst_28 = arith.constant 0.000000e+00 : f32
    %50 = vector.broadcast %cst_28 : f32 to vector<128x128xf32>
    %51 = arith.select %31, %7, %50 : vector<128x128xi1>, vector<128x128xf32>
    %cst_29 = arith.constant dense<0.000000e+00> : vector<128xf32>
    %52 = vector.multi_reduction <add>, %51, %cst_29 [1] : vector<128x128xf32> to vector<128xf32>
    %53 = vector.shape_cast %52 : vector<128xf32> to vector<128x1xf32>
    %54 = arith.addf %49, %53 : vector<128x1xf32>
    %c0_30 = arith.constant 0 : index
    %c0_31 = arith.constant 0 : index
    %55 = vector.load %arg13[%c0_30, %c0_31] : memref<128x1xf32, #tpu.memory_space<vmem>>, vector<128x1xf32>
    tpu.vector_store %arg13[%c0_30, %c0_31], %54 {strides = array<i32>} : memref<128x1xf32, #tpu.memory_space<vmem>>, vector<128x1xf32>,
    %c0_32 = arith.constant 0 : index
    %c0_33 = arith.constant 0 : index
    %56 = vector.load %arg11[%c0_32, %c0_33] : memref<128x1xf32, #tpu.memory_space<vmem>>, vector<128x1xf32>
    tpu.vector_store %arg11[%c0_32, %c0_33], %37 {strides = array<i32>} : memref<128x1xf32, #tpu.memory_space<vmem>>, vector<128x1xf32>,
    %c0_i32_34 = arith.constant 0 : i32
    %57 = arith.cmpi eq, %arg1, %c0_i32_34 : i32
    %58 = arith.extui %57 : i1 to i32
    %c0_i32_35 = arith.constant 0 : i32
    %59 = arith.cmpi ne, %58, %c0_i32_35 : i32
    scf.if %59 {
      %c0_36 = arith.constant 0 : index
      %c0_37 = arith.constant 0 : index
      %60 = vector.load %arg13[%c0_36, %c0_37] : memref<128x1xf32, #tpu.memory_space<vmem>>, vector<128x1xf32>
      %cst_38 = arith.constant 1.000000e+00 : f32
      %61 = vector.broadcast %cst_38 : f32 to vector<128x1xf32>
      %62 = arith.mulf %60, %61 : vector<128x1xf32>
      %c0_39 = arith.constant 0 : index
      %c0_40 = arith.constant 0 : index
      %63 = vector.load %arg11[%c0_39, %c0_40] : memref<128x1xf32, #tpu.memory_space<vmem>>, vector<128x1xf32>
      %64 = arith.subf %62, %63 : vector<128x1xf32>
      %c0_41 = arith.constant 0 : index
      %c0_42 = arith.constant 0 : index
      %65 = vector.load %arg12[%c0_41, %c0_42] : memref<128x1xf32, #tpu.memory_space<vmem>>, vector<128x1xf32>
      %66 = math.log %65 : vector<128x1xf32>
      %67 = arith.subf %64, %66 : vector<128x1xf32>
      %cst_43 = arith.constant 0.000000e+00 : f32
      %68 = vector.broadcast %cst_43 : f32 to vector<128x1xf32>
      %69 = arith.subf %68, %67 : vector<128x1xf32>
      %c16_i32_44 = arith.constant 16 : i32
      %70 = vector.broadcast %c16_i32_44 : i32 to vector<128x1xi32>
      %71 = arith.cmpi slt, %8, %70 : vector<128x1xi32>
      %cst_45 = arith.constant 0.000000e+00 : f32
      %72 = vector.broadcast %cst_45 : f32 to vector<128x1xf32>
      %73 = arith.select %71, %69, %72 : vector<128x1xi1>, vector<128x1xf32>
      %c0_46 = arith.constant 0 : index
      %c0_47 = arith.constant 0 : index
      %74 = vector.load %arg10[%c0_46, %c0_47] : memref<128x1xf32, #tpu.memory_space<vmem>>, vector<128x1xf32>
      tpu.vector_store %arg10[%c0_46, %c0_47], %73 {strides = array<i32>} : memref<128x1xf32, #tpu.memory_space<vmem>>, vector<128x1xf32>,
    } else {
    }
    return
  }
  func.func @transform_0(%arg0: i32, %arg1: i32) -> (i32, i32) {
    %c0_i32 = arith.constant 0 : i32
    %c0_i32_0 = arith.constant 0 : i32
    return %arg0, %c0_i32 : i32, i32
  }
  func.func @transform_1(%arg0: i32, %arg1: i32) -> (i32, i32) {
    %c0_i32 = arith.constant 0 : i32
    %c0_i32_0 = arith.constant 0 : i32
    return %arg0, %c0_i32 : i32, i32
  }
  func.func @transform_2(%arg0: i32, %arg1: i32) -> (i32, i32) {
    %c0_i32 = arith.constant 0 : i32
    %c0_i32_0 = arith.constant 0 : i32
    return %arg0, %c0_i32 : i32, i32
  }
  func.func @transform_3(%arg0: i32, %arg1: i32) -> (i32, i32) {
    %c0_i32 = arith.constant 0 : i32
    %c0_i32_0 = arith.constant 0 : i32
    return %c0_i32, %arg1 : i32, i32
  }
  func.func @transform_4(%arg0: i32, %arg1: i32) -> (i32, i32) {
    %c0_i32 = arith.constant 0 : i32
    %c0_i32_0 = arith.constant 0 : i32
    return %c0_i32, %arg1 : i32, i32
  }
  func.func @transform_5(%arg0: i32, %arg1: i32) -> (i32, i32) {
    %c0_i32 = arith.constant 0 : i32
    %c0_i32_0 = arith.constant 0 : i32
    return %c0_i32, %arg1 : i32, i32
  }
  func.func @transform_6(%arg0: i32, %arg1: i32) -> (i32, i32) {
    %c0_i32 = arith.constant 0 : i32
    %c0_i32_0 = arith.constant 0 : i32
    return %arg0, %c0_i32 : i32, i32
  }
  func.func @transform_7(%arg0: i32, %arg1: i32) -> (i32, i32) {
    %c0_i32 = arith.constant 0 : i32
    %c0_i32_0 = arith.constant 0 : i32
    return %c0_i32, %arg1 : i32, i32
  }
  func.func @transform_8(%arg0: i32, %arg1: i32) -> (i32, i32) {
    %c0_i32 = arith.constant 0 : i32
    %c0_i32_0 = arith.constant 0 : i32
    return %arg0, %c0_i32 : i32, i32
  }
}

</mosaic_0001>

<bundles_post_ra>
// kernel: tpu_custom_call.1
= control target key start
LH: loop header
LB: loop body
LE: loop exit
PB: predicated region body
PF: predicated region fallthrough
CT: control target
= control target key end

     0   :  { %v1408_v0 = vmov 0   ;;  %vm155_vm0 = vcmask 261120   ;;  %s2787_s2 = inlined_call_operand.vmem [shape: s32[128,1], index: 2, kind: input, shape index: {}]   ;;  %s2788_s7 = inlined_call_operand.vmem [shape: bf16[32,128], index: 7, kind: input, shape index: {}]   ;;  %s2789_s6 = inlined_call_operand.vmem [shape: bf16[128,32], index: 6, kind: input, shape index: {}]   ;;  %s2790_s5 = inlined_call_operand.vmem [shape: s32[1,128], index: 5, kind: input, shape index: {}]   ;;  %s2791_s4 = inlined_call_operand.vmem [shape: s32[1,128], index: 4, kind: input, shape index: {}]   ;;  %s2792_s1 = inlined_call_operand.vmem [shape: s32[128,1], index: 1, kind: input, shape index: {}]   ;;  %s2793_s0 = inlined_call_operand.vmem [shape: s32[128,1], index: 0, kind: input, shape index: {}]   ;;  %s2794_s3 = inlined_call_operand.vmem [shape: s32[1,128], index: 3, kind: input, shape index: {}]   ;;  %s2795_s8 = inlined_call_operand.vmem [shape: f32[128,1], index: 8, kind: output, shape index: {}]  }
   0x1   :  { %1292 = vset.pattern.permute.xlu2 %v1408_v0  ;;  %1291 = vset.pattern.permute.xlu1 %v1408_v0  ;;  %v281_v1 = vld [vmem:[%s2787_s2 + $0x20] sm:$0xff]  ;;  %v279_v2 = vld [vmem:[%s2787_s2 + $0x10] sm:$0xff]  ;;  %v1280_v4 = vld [vmem:[%s2788_s7 + $0x8] sm:$0xff] }
   0x2   :  { %1290 = vset.pattern.permute.xlu0 %v1408_v0  ;;  %309 = vperm.xlu2 %1292, %v281_v1   ;;  %v277_v3 = vld [vmem:[%s2787_s2] sm:$0xff]  ;;  %v282_v6 = vld [vmem:[%s2787_s2 + $0x28] sm:$0xff]  ;;  %v280_v7 = vld [vmem:[%s2787_s2 + $0x18] sm:$0xff] }
   0x3   :  { %303 = vperm.xlu1 %1291, %v279_v2   ;;  %297 = vperm.xlu0 %1290, %v277_v3   ;;  %v1279_v5 = vld [vmem:[%s2788_s7] sm:$0xff]  ;;  %v278_v8 = vld [vmem:[%s2787_s2 + $0x8] sm:$0xff]  ;;  %v1273_v10 = vld [vmem:[%s2789_s6 + $0x10] sm:$0xff] }
   0x4   :  { %186 = vmatpush.bf16.msra.mxu0 %v1280_v4  ;;  %1281 = vmatpush.bf16.msra.mxu1 %v1280_v4  ;;  %v1271_v9 = vld [vmem:[%s2789_s6] sm:$0xff]  ;;  %v284_v12 = vld [vmem:[%s2787_s2 + $0x38] sm:$0xff]  ;;  %v283_v13 = vld [vmem:[%s2787_s2 + $0x30] sm:$0xff] }
   0x5   :  { %1282 = vmatpush.bf16.msra.mxu2 %v1280_v4  ;;  %1283 = vmatpush.bf16.msra.mxu3 %v1280_v4  ;;  %v285_v11 = vld [vmem:[%s2787_s2 + $0x40] sm:$0xff]  ;;  %v1277_v15 = vld [vmem:[%s2789_s6 + $0x30] sm:$0xff]  ;;  %v288_v16 = vld [vmem:[%s2787_s2 + $0x58] sm:$0xff] }
   0x6   :  { %v1275_v14 = vld [vmem:[%s2789_s6 + $0x20] sm:$0xff]  ;;  %v287_v17 = vld [vmem:[%s2787_s2 + $0x50] sm:$0xff]  ;;  %v286_v18 = vld [vmem:[%s2787_s2 + $0x48] sm:$0xff] }
   0x7   :  { %v1272_v19 = vld [vmem:[%s2789_s6 + $0x8] sm:$0xff]  ;;  %v1274_v20 = vld [vmem:[%s2789_s6 + $0x18] sm:$0xff]  ;;  %v291_v21 = vld [vmem:[%s2787_s2 + $0x70] sm:$0xff] }
   0x8   :  { %187 = vmatpush.bf16.msra.mxu0 %v1279_v5  ;;  %1284 = vmatpush.bf16.msra.mxu1 %v1279_v5  ;;  %v290_v22 = vld [vmem:[%s2787_s2 + $0x68] sm:$0xff]  ;;  %v289_v23 = vld [vmem:[%s2787_s2 + $0x60] sm:$0xff]  ;;  %v1278_v24 = vld [vmem:[%s2789_s6 + $0x38] sm:$0xff] }
   0x9   :  { %1285 = vmatpush.bf16.msra.mxu2 %v1279_v5  ;;  %1286 = vmatpush.bf16.msra.mxu3 %v1279_v5  ;;  %v262_v25 = vld [vmem:[%s2792_s1 + $0x8] sm:$0xff]  ;;  %v292_v26 = vld [vmem:[%s2787_s2 + $0x78] sm:$0xff]  ;;  %v261_v27 = vld [vmem:[%s2792_s1] sm:$0xff] }
   0xa   :  { %312 = vperm.xlu2 %1292, %v282_v6   ;;  %v1276_v28 = vld [vmem:[%s2789_s6 + $0x28] sm:$0xff]  ;;  %v265_v29 = vld [vmem:[%s2792_s1 + $0x20] sm:$0xff]  ;;  %v263_v30 = vld [vmem:[%s2792_s1 + $0x10] sm:$0xff] }
   0xb   :  { %306 = vperm.xlu1 %1291, %v280_v7   ;;  %300 = vperm.xlu0 %1290, %v278_v8   ;;  %v264_v31 = vld [vmem:[%s2792_s1 + $0x18] sm:$0xff]  ;;  %v266_v33 = vld [vmem:[%s2792_s1 + $0x28] sm:$0xff]  ;;  %v267_v34 = vld [vmem:[%s2792_s1 + $0x30] sm:$0xff] }
   0xc   :  { %1263 = vmatmul.msk.bf16.vlgmr.msra.gmra.mxu0 %vm155_vm0, %v1271_v9  ;;  %1265 = vmatmul.msk.bf16.vlgmr.msra.gmra.mxu1 %vm155_vm0, %v1273_v10  ;;  %v268_v32 = vld [vmem:[%s2792_s1 + $0x38] sm:$0xff]  ;;  %v271_v35 = vld [vmem:[%s2792_s1 + $0x50] sm:$0xff]  ;;  %v269_v36 = vld [vmem:[%s2792_s1 + $0x40] sm:$0xff] }
   0xd   :  { %1267 = vmatmul.msk.bf16.vlgmr.msra.gmra.mxu2 %vm155_vm0, %v1275_v14  ;;  %1269 = vmatmul.msk.bf16.vlgmr.msra.gmra.mxu3 %vm155_vm0, %v1277_v15  ;;  %v270_v37 = vld [vmem:[%s2792_s1 + $0x48] sm:$0xff]  ;;  %v272_v39 = vld [vmem:[%s2792_s1 + $0x58] sm:$0xff]  ;;  %v273_v40 = vld [vmem:[%s2792_s1 + $0x60] sm:$0xff]  ;;  %v2851_v14 = vmov 0 }
   0xe   :  { %v274_v38 = vld [vmem:[%s2792_s1 + $0x68] sm:$0xff]  ;;  %v245_v41 = vld [vmem:[%s2793_s0] sm:$0xff]  ;;  %v275_v42 = vld [vmem:[%s2792_s1 + $0x70] sm:$0xff] }
   0xf   :  { %v276_v43 = vld [vmem:[%s2792_s1 + $0x78] sm:$0xff]  ;;  %v247_v45 = vld [vmem:[%s2793_s0 + $0x10] sm:$0xff]  ;;  %v246_v46 = vld [vmem:[%s2793_s0 + $0x8] sm:$0xff] }
  0x10   :  { %v248_v44 = vld [vmem:[%s2793_s0 + $0x18] sm:$0xff]  ;;  %v251_v48 = vld [vmem:[%s2793_s0 + $0x30] sm:$0xff]  ;;  %v250_v49 = vld [vmem:[%s2793_s0 + $0x28] sm:$0xff] }
  0x11   :  { %v249_v50 = vld [vmem:[%s2793_s0 + $0x20] sm:$0xff]  ;;  %v254_v52 = vld [vmem:[%s2793_s0 + $0x48] sm:$0xff]  ;;  %v252_v54 = vld [vmem:[%s2793_s0 + $0x38] sm:$0xff] }
  0x12   :  { %321 = vperm.xlu2 %1292, %v285_v11   ;;  %v253_v53 = vld [vmem:[%s2793_s0 + $0x40] sm:$0xff]  ;;  %v256_v57 = vld [vmem:[%s2793_s0 + $0x58] sm:$0xff]  ;;  %v255_v58 = vld [vmem:[%s2793_s0 + $0x50] sm:$0xff] }
  0x13   :  { %318 = vperm.xlu1 %1291, %v284_v12   ;;  %315 = vperm.xlu0 %1290, %v283_v13   ;;  %v257_v56 = vld [vmem:[%s2793_s0 + $0x60] sm:$0xff]  ;;  %v260_v62 = vld [vmem:[%s2793_s0 + $0x78] sm:$0xff]  ;;  %v259_v63 = vld [vmem:[%s2793_s0 + $0x70] sm:$0xff] }
  0x14   :  { %v258_v1 = vld [vmem:[%s2793_s0 + $0x68] sm:$0xff]  ;;  %v1660_v5 = vld [vmem:[%s2791_s4] ss:$0 sm:$0xff] }
  0x15   :  { %v1665_v6 = vld [vmem:[%s2790_s5] ss:$0 sm:$0xff] }
  0x1a   :  { %330 = vperm.xlu2 %1292, %v288_v16  }
  0x1b   :  { %327 = vperm.xlu1 %1291, %v287_v17   ;;  %324 = vperm.xlu0 %1290, %v286_v18  }
  0x1c   :  { %1264 = vmatmul.msk.bf16.gmra.mxu0 %vm155_vm0, %v1272_v19  ;;  %1266 = vmatmul.msk.bf16.gmra.mxu1 %vm155_vm0, %v1274_v20 }
  0x1d   :  { %1270 = vmatmul.msk.bf16.gmra.mxu3 %vm155_vm0, %v1278_v24  ;;  %1268 = vmatmul.msk.bf16.gmra.mxu2 %vm155_vm0, %v1276_v28 }
  0x22   :  { %339 = vperm.xlu2 %1292, %v291_v21  }
  0x23   :  { %336 = vperm.xlu1 %1291, %v290_v22   ;;  %333 = vperm.xlu0 %1290, %v289_v23   ;;  %v293_v22 = vld [vmem:[%s2794_s3] sm:$0x1] }
  0x24   :  { %vm491_vm10 = vcmp.lt.s32.totalorder %v293_v22, 16 }
  0x2a   :  { %365 = vperm.xlu2 %1292, %v262_v25  }
  0x2b   :  { %342 = vperm.xlu0 %1290, %v292_v26   ;;  %362 = vperm.xlu1 %1291, %v261_v27   ;;  %v524_v26 = vsel %vm491_vm10, 1, %v1408_v0  ;;  %v1722_v27 = vld [vmem:[%s2794_s3] ss:$0 sm:$0xff] }
  0x2c   :  { %v525_v28 = vperm.slane %v524_v26, 0 }
  0x2e   :  { %vm1727_vm15 = vcmp.eq.s32.totalorder %v525_v28, 1 }
  0x32   :  { %374 = vperm.xlu2 %1292, %v265_v29  }
  0x33   :  { %368 = vperm.xlu0 %1290, %v263_v30   ;;  %371 = vperm.xlu1 %1291, %v264_v31  }
  0x3a   :  { %383 = vperm.xlu2 %1292, %v268_v32  }
  0x3b   :  { %377 = vperm.xlu0 %1290, %v266_v33   ;;  %380 = vperm.xlu1 %1291, %v267_v34  }
  0x42   :  { %392 = vperm.xlu2 %1292, %v271_v35  }
  0x43   :  { %386 = vperm.xlu0 %1290, %v269_v36   ;;  %389 = vperm.xlu1 %1291, %v270_v37  }
  0x4a   :  { %401 = vperm.xlu2 %1292, %v274_v38  }
  0x4b   :  { %395 = vperm.xlu0 %1290, %v272_v39   ;;  %398 = vperm.xlu1 %1291, %v273_v40  }
  0x52   :  { %427 = vperm.xlu2 %1292, %v245_v41  }
  0x53   :  { %404 = vperm.xlu0 %1290, %v275_v42   ;;  %407 = vperm.xlu1 %1291, %v276_v43  }
  0x5a   :  { %436 = vperm.xlu2 %1292, %v248_v44  }
  0x5b   :  { %433 = vperm.xlu1 %1291, %v247_v45   ;;  %430 = vperm.xlu0 %1290, %v246_v46  }
  0x5c   :  { %v1605_v47 = vpop.permute.xlu2 %309 }
  0x5d   :  { %vm2797_vm4 = vcmp.eq.s32.totalorder %v1605_v47, %v1665_v6 }
  0x62   :  { %445 = vperm.xlu2 %1292, %v251_v48  }
  0x63   :  { %442 = vperm.xlu1 %1291, %v250_v49   ;;  %439 = vperm.xlu0 %1290, %v249_v50  }
  0x64   :  { %v1616_v51 = vpop.permute.xlu2 %312 }
  0x6a   :  { %454 = vperm.xlu2 %1292, %v254_v52  }
  0x6b   :  { %451 = vperm.xlu1 %1291, %v253_v53   ;;  %448 = vperm.xlu0 %1290, %v252_v54  }
  0x6c   :  { %v1627_v55 = vpop.permute.xlu2 %321 }
  0x72   :  { %463 = vperm.xlu2 %1292, %v257_v56  }
  0x73   :  { %460 = vperm.xlu1 %1291, %v256_v57   ;;  %457 = vperm.xlu0 %1290, %v255_v58  }
  0x74   :  { %v1638_v59 = vpop.permute.xlu2 %330 }
  0x75   :  { %v1640_v60 = vpop.permute.xlu1 %303  ;;  %v298_v61 = vpop.permute.xlu0 %297 }
  0x76   :  { %vm345_vm12 = vcmp.eq.s32.totalorder %v298_v61, %v1665_v6 }
  0x7a   :  { %472 = vperm.xlu2 %1292, %v260_v62  }
  0x7b   :  { %469 = vperm.xlu1 %1291, %v259_v63   ;;  %466 = vperm.xlu0 %1290, %v258_v1   ;;  %v2840_v63 = vmov 0 }
  0x7c   :  { %v1651_v2 = vpop.permute.xlu2 %339 }
  0x7d   :  { %v1653_v3 = vpop.permute.xlu1 %306  ;;  %v1655_v4 = vpop.permute.xlu0 %300 }
  0x7e   :  { %vm2798_vm1 = vcmp.eq.s32.totalorder %v1655_v4, %v1665_v6 }
  0x84   :  { %v366_v7 = vpop.permute.xlu2 %365 }
  0x85   :  { %v1669_v8 = vpop.permute.xlu1 %318  ;;  %v1671_v9 = vpop.permute.xlu0 %315  ;;  %vm411_vm2 = vcmp.ne.s32.totalorder %v366_v7, %v1660_v5 }
  0x86   :  { %vm1677_vm3 = vmor %vm2798_vm1, %vm411_vm2  ;;  %vm2796_vm7 = vcmp.eq.s32.totalorder %v1669_v8, %v1665_v6 }
  0x89   :  { %v189_v32 = vpop.f32.mrf.mxu0  ;;  %v1748_v43 = vpop.f32.mrf.mxu1 }
  0x8a   :  { %v229_v0 = vmul.f32 2.0, %v189_v32 }
  0x8c   :  { %v375_v11 = vpop.permute.xlu2 %374 }
  0x8d   :  { %v1683_v12 = vpop.permute.xlu1 %327  ;;  %v1685_v13 = vpop.permute.xlu0 %324  ;;  %vm414_vm5 = vcmp.ne.s32.totalorder %v375_v11, %v1660_v5 }
  0x8e   :  { %vm1691_vm6 = vmor %vm2797_vm4, %vm414_vm5 }
  0x90   :  { %v1756_v48 = vpop.f32.mrf.mxu2 }
  0x91   :  { %v191_v42 = vpop.f32.mrf.mxu0  ;;  %v201_v54 = vpop.f32.mrf.mxu1  ;;  %v2019_v61 = vmul.f32 2.0, %v1756_v48 }
  0x92   :  { %v1817_v62 = vmul.f32 2.0, %v191_v42  ;;  %v1918_v32 = vmul.f32 2.0, %v201_v54 }
  0x94   :  { %v384_v15 = vpop.permute.xlu2 %383 }
  0x95   :  { %v1697_v16 = vpop.permute.xlu1 %336  ;;  %v1699_v17 = vpop.permute.xlu0 %333  ;;  %vm417_vm8 = vcmp.ne.s32.totalorder %v384_v15, %v1660_v5 }
  0x96   :  { %vm1705_vm9 = vmor %vm2796_vm7, %vm417_vm8 }
  0x98   :  { %v1831_v1 = vpop.f32.mrf.mxu2 }
  0x99   :  { %v194_v49 = vpop.f32.mrf.mxu0  ;;  %v204_v28 = vpop.f32.mrf.mxu1 }
  0x9a   :  { %v1808_v58 = vmul.f32 2.0, %v194_v49 }
  0x9c   :  { %v1709_v19 = vpop.permute.xlu2 %392 }
  0x9d   :  { %v1711_v20 = vpop.permute.xlu0 %342  ;;  %v363_v21 = vpop.permute.xlu1 %362 }
  0x9e   :  { %vm410_vm11 = vcmp.ne.s32.totalorder %v363_v21, %v1660_v5 }
  0x9f   :  { %vm492_vm14 = vmor %vm345_vm12, %vm410_vm11 }
  0xa1   :  { %v206_v56 = vpop.f32.mrf.mxu1 }
  0xa4   :  { %v1716_v23 = vpop.permute.xlu2 %401 }
  0xa5   :  { %v369_v24 = vpop.permute.xlu0 %368  ;;  %v372_v25 = vpop.permute.xlu1 %371 }
  0xa6   :  { %vm412_vm10 = vcmp.ne.s32.totalorder %v369_v24, %v1660_v5  ;;  %vm413_vm11 = vcmp.ne.s32.totalorder %v372_v25, %v1660_v5  ;;  %v196_v24 = vpop.f32.mrf.mxu0  ;;  %v1873_v25 = vpop.f32.mrf.mxu3 }
  0xa7   :  { %v241_v18 = vmul.f32 2.0, %v1873_v25 }
  0xac   :  { %v428_v29 = vpop.permute.xlu2 %427 }
  0xad   :  { %v378_v30 = vpop.permute.xlu0 %377  ;;  %v381_v31 = vpop.permute.xlu1 %380  ;;  %vm475_vm13 = vcmp.ne.s32.totalorder %v428_v29, %v1722_v27  ;;  %v1409_v29 = vmov -1e+30  }
  0xae   :  { %vm508_vm0 = vmand %vm492_vm14, %vm475_vm13  ;;  %v221_v57 = vpop.f32.mrf.mxu3 }
  0xaf   :  { %vm543_vm2 = vmand %vm345_vm12, %vm475_vm13  ;;  %vm2803_vm12 = vcmp.eq.s32.totalorder %v1640_v60, %v1665_v6  ;;  %vm415_vm13 = vcmp.ne.s32.totalorder %v378_v30, %v1660_v5  ;;  %v1907_v30 = vmul.f32 2.0, %v196_v24 }
  0xb0   :  { %vm527_vm5 = vmand %vm508_vm0, %vm1727_vm15  ;;  %vm2799_vm0 = vcmp.eq.s32.totalorder %v1653_v3, %v1665_v6 }
  0xb1   :  { %v1733_v34 = vsel %vm527_vm5, %v229_v0, -1e+30  ;;  %vm559_vm8 = vmand %vm543_vm2, %vm1727_vm15 }
  0xb2   :  { %591 = vmax.xlane.f32.xlu0 %v1733_v34  ;;  %v1740_v36 = vsel %vm559_vm8, %v229_v0, 0.0  ;;  %vm494_vm2 = vmor %vm2803_vm12, %vm412_vm10  ;;  %vm2800_vm8 = vcmp.eq.s32.totalorder %v1616_v51, %v1665_v6  ;;  %v1935_v0 = vmul.f32 2.0, %v1748_v43 }
  0xb3   :  { %vm495_vm7 = vmor %vm2799_vm0, %vm413_vm11 }
  0xb4   :  { %v1738_v35 = vpop.permute.xlu2 %436  ;;  %vm1788_vm1 = vmor %vm2800_vm8, %vm415_vm13  ;;  %vm2806_vm13 = vcmp.eq.s32.totalorder %v1699_v17, %v1665_v6  ;;  %vm416_vm8 = vcmp.ne.s32.totalorder %v381_v31, %v1660_v5 }
  0xb5   :  { %v387_v37 = vpop.permute.xlu0 %386  ;;  %v390_v38 = vpop.permute.xlu1 %389  ;;  %vm2802_vm14 = vcmp.ne.s32.totalorder %v1738_v35, %v1722_v27 }
  0xb6   :  { %vm1795_vm10 = vmand %vm495_vm7, %vm2802_vm14  ;;  %vm2807_vm14 = vcmp.eq.s32.totalorder %v1671_v9, %v1665_v6  ;;  %v224_v42 = vpop.f32.mrf.mxu3 }
  0xbc   :  { %v1742_v39 = vpop.permute.xlu2 %445 }
  0xbd   :  { %v1744_v40 = vpop.permute.xlu0 %395  ;;  %v1746_v41 = vpop.permute.xlu1 %398  ;;  %vm2809_vm12 = vcmp.ne.s32.totalorder %v1742_v39, %v1722_v27 }
  0xc4   :  { %v1750_v44 = vpop.permute.xlu2 %454 }
  0xc5   :  { %v1752_v45 = vpop.permute.xlu0 %404  ;;  %v1754_v46 = vpop.permute.xlu1 %407 }
  0xcc   :  { %v1760_v50 = vpop.permute.xlu2 %463 }
  0xcd   :  { %v1767_v52 = vpop.permute.xlu1 %433  ;;  %v1769_v53 = vpop.permute.xlu0 %430  ;;  %vm2805_vm11 = vcmp.ne.s32.totalorder %v1760_v50, %v1722_v27 }
  0xce   :  { %vm2801_vm5 = vcmp.ne.s32.totalorder %v1769_v53, %v1722_v27  ;;  %vm2804_vm4 = vcmp.ne.s32.totalorder %v1767_v52, %v1722_v27 }
  0xcf   :  { %vm509_vm0 = vmand %vm1677_vm3, %vm2801_vm5  ;;  %vm418_vm5 = vcmp.ne.s32.totalorder %v387_v37, %v1660_v5  ;;  %v214_v37 = vpop.f32.mrf.mxu2 }
  0xd0   :  { %vm1813_vm7 = vmand %vm494_vm2, %vm2804_vm4 }
  0xd1   :  { %vm1826_vm3 = vmand %vm2806_vm13, %vm2805_vm11  ;;  %vm419_vm13 = vcmp.ne.s32.totalorder %v390_v38, %v1660_v5 }
  0xd2   :  { %v2841_v63 = vsel %vm1826_vm3, 4294967295, %v2840_v63  ;;  %vm528_vm2 = vmand %vm509_vm0, %vm1727_vm15  ;;  %vm2808_vm0 = vcmp.eq.s32.totalorder %v1627_v55, %v1665_v6  ;;  %vm420_vm3 = vcmp.ne.s32.totalorder %v1709_v19, %v1660_v5  ;;  %v2016_v19 = vmul.f32 2.0, %v204_v28 }
  0xd3   :  { %v1842_v10 = vsel %vm528_vm2, %v1817_v62, -1e+30  ;;  %vm529_vm4 = vmand %vm1813_vm7, %vm1727_vm15  ;;  %v242_v28 = vmul.f32 2.0, %v221_v57 }
  0xd4   :  { %v1835_v7 = vpop.permute.xlu2 %472  ;;  %vm498_vm11 = vmor %vm2807_vm14, %vm416_vm8  ;;  %593 = vmax.xlane.f32.xlu1 %v1842_v10  ;;  %v1860_v21 = vsel %vm529_vm4, %v1808_v58, -1e+30  ;;  %vm2810_vm14 = vcmp.eq.s32.totalorder %v1685_v13, %v1665_v6 }
  0xd5   :  { %v1848_v11 = vpop.permute.xlu1 %442  ;;  %v1850_v15 = vpop.permute.xlu0 %439  ;;  %vm1869_vm2 = vmor %vm2808_vm0, %vm418_vm5  ;;  %595 = vmax.xlane.f32.xlu2 %v1860_v21  ;;  %vm2812_vm0 = vcmp.ne.s32.totalorder %v1835_v7, %v1722_v27 }
  0xd6   :  { %vm2811_vm7 = vcmp.ne.s32.totalorder %v1848_v11, %v1722_v27  ;;  %vm1887_vm5 = vmand %vm498_vm11, %vm2809_vm12  ;;  %vm2813_vm12 = vcmp.eq.s32.totalorder %v1711_v20, %v1665_v6  ;;  %vm2848_vm8 = vcmp.ne.s32.totalorder %v1850_v15, %v1722_v27 }
  0xd7   :  { %vm1896_vm4 = vmor %vm2810_vm14, %vm419_vm13  ;;  %vm421_vm14 = vcmp.ne.s32.totalorder %v1744_v40, %v1660_v5 }
  0xd8   :  { %vm513_vm11 = vmand %vm1788_vm1, %vm2811_vm7  ;;  %vm422_vm1 = vcmp.ne.s32.totalorder %v1746_v41, %v1660_v5 }
  0xd9   :  { %vm1914_vm13 = vmand %vm1691_vm6, %vm2848_vm8  ;;  %vm2814_vm8 = vcmp.eq.s32.totalorder %v1638_v59, %v1665_v6 }
  0xda   :  { %vm1930_vm7 = vmand %vm2813_vm12, %vm2812_vm0 }
  0xdb   :  { %v2852_v14 = vsel %vm1930_vm7, 4294967295, %v2851_v14  ;;  %vm532_vm6 = vmand %vm513_vm11, %vm1727_vm15  ;;  %vm423_vm7 = vcmp.ne.s32.totalorder %v1716_v23, %v1660_v5 }
  0xdc   :  { %v1944_v38 = vsel %vm532_vm6, %v1918_v32, -1e+30  ;;  %vm531_vm0 = vmand %vm1914_vm13, %vm1727_vm15  ;;  %vm2855_vm6 = vcmp.eq.s32.totalorder %v1699_v17, %v1665_v6 }
  0xdd   :  { %v1950_v40 = vpop.permute.xlu1 %451  ;;  %v1952_v41 = vpop.permute.xlu0 %448  ;;  %vm1957_vm11 = vmor %vm2814_vm8, %vm421_vm14  ;;  %601 = vmax.xlane.f32.xlu1 %v1944_v38  ;;  %v1970_v49 = vsel %vm531_vm0, %v1935_v0, -1e+30  ;;  %vm2818_vm0 = vcmp.ne.s32.totalorder %v1750_v44, %v1722_v27 }
  0xde   :  { %vm1964_vm12 = vmor %vm2855_vm6, %vm422_vm1  ;;  %vm2815_vm13 = vcmp.ne.s32.totalorder %v1950_v40, %v1722_v27  ;;  %vm2816_vm1 = vcmp.ne.s32.totalorder %v1952_v41, %v1722_v27  ;;  %vm2817_vm6 = vcmp.eq.s32.totalorder %v1683_v12, %v1665_v6  ;;  %599 = vmax.xlane.f32.xlu0 %v1970_v49 }
  0xdf   :  { %vm2858_vm14 = vmand %vm1795_vm10, %vm1727_vm15  ;;  %vm425_vm10 = vcmp.ne.s32.totalorder %v1754_v46, %v1660_v5  ;;  %v2032_v46 = vmul.f32 2.0, %v206_v56  ;;  %v239_v56 = vmul.f32 2.0, %v214_v37 }
  0xe0   :  { %v1978_v54 = vsel %vm2858_vm14, %v1907_v30, -1e+30  ;;  %vm2000_vm14 = vmor %vm2817_vm6, %vm420_vm3 }
  0xe1   :  { %597 = vmax.xlane.f32.xlu2 %v1978_v54  ;;  %vm516_vm8 = vmand %vm1869_vm2, %vm2815_vm13  ;;  %vm424_vm13 = vcmp.ne.s32.totalorder %v1752_v45, %v1660_v5  ;;  %v2114_v5 = vmul.f32 2.0, %v1831_v1 }
  0xe2   :  { %vm515_vm3 = vmand %vm1705_vm9, %vm2816_vm1  ;;  %vm2863_vm1 = vcmp.eq.s32.totalorder %v1711_v20, %v1665_v6 }
  0xe3   :  { %vm2026_vm2 = vmand %vm1896_vm4, %vm2818_vm0  ;;  %vm2819_vm0 = vcmp.eq.s32.totalorder %v1651_v2, %v1665_v6 }
  0xe4   :  { %vm535_vm9 = vmand %vm516_vm8, %vm1727_vm15 }
  0xe5   :  { %vm2039_vm6 = vmor %vm2863_vm1, %vm425_vm10  ;;  %v2044_v48 = vsel %vm535_vm9, %v2019_v61, -1e+30  ;;  %v461_v20 = vpop.permute.xlu1 %460  ;;  %v458_v24 = vpop.permute.xlu0 %457  ;;  %vm2868_vm10 = vcmp.ne.s32.totalorder %v1760_v50, %v1722_v27 }
  0xe6   :  { %vm534_vm4 = vmand %vm515_vm3, %vm1727_vm15  ;;  %607 = vmax.xlane.f32.xlu1 %v2044_v48  ;;  %vm486_vm9 = vcmp.ne.s32.totalorder %v461_v20, %v1722_v27  ;;  %v216_v50 = vpop.f32.mrf.mxu2 }
  0xe7   :  { %v2053_v45 = vsel %vm534_vm4, %v2032_v46, -1e+30  ;;  %vm2062_vm1 = vmor %vm2819_vm0, %vm424_vm13  ;;  %vm485_vm4 = vcmp.ne.s32.totalorder %v458_v24, %v1722_v27  ;;  %v240_v23 = vmul.f32 2.0, %v216_v50  ;;  %v226_v50 = vpop.f32.mrf.mxu3 }
  0xe8   :  { %vm2071_vm3 = vmand %vm1964_vm12, %vm2868_vm10  ;;  %vm2820_vm12 = vcmp.eq.s32.totalorder %v1697_v16, %v1665_v6  ;;  %605 = vmax.xlane.f32.xlu0 %v2053_v45  ;;  %v244_v24 = vmul.f32 2.0, %v226_v50 }
  0xe9   :  { %vm2871_vm13 = vmand %vm1887_vm5, %vm1727_vm15 }
  0xea   :  { %v2082_v31 = vsel %vm2871_vm13, %v2016_v19, -1e+30  ;;  %vm519_vm10 = vmand %vm1957_vm11, %vm486_vm9  ;;  %vm2874_vm13 = vcmp.eq.s32.totalorder %v1638_v59, %v1665_v6 }
  0xeb   :  { %603 = vmax.xlane.f32.xlu2 %v2082_v31  ;;  %vm2098_vm5 = vmor %vm2820_vm12, %vm423_vm7  ;;  %vm2877_vm7 = vcmp.ne.s32.totalorder %v1767_v52, %v1722_v27  ;;  %vm2878_vm12 = vcmp.eq.s32.totalorder %v1640_v60, %v1665_v6 }
  0xec   :  { %vm2105_vm0 = vmand %vm2874_vm13, %vm486_vm9  ;;  %vm2881_vm13 = vcmp.ne.s32.totalorder %v1835_v7, %v1722_v27  ;;  %v243_v7 = vmul.f32 2.0, %v224_v42 }
  0xed   :  { %vm518_vm11 = vmand %vm2000_vm14, %vm485_vm4  ;;  %v470_v1 = vpop.permute.xlu1 %469  ;;  %v467_v37 = vpop.permute.xlu0 %466 }
  0xee   :  { %vm2122_vm8 = vmand %vm2878_vm12, %vm2877_vm7 }
  0xef   :  { %vm538_vm9 = vmand %vm519_vm10, %vm1727_vm15 }
  0xf0   :  { %v2128_v17 = vsel %vm538_vm9, %v240_v23, -1e+30  ;;  %vm537_vm14 = vmand %vm518_vm11, %vm1727_vm15  ;;  %vm489_vm11 = vcmp.ne.s32.totalorder %v470_v1, %v1722_v27 }
  0xf1   :  { %vm2137_vm12 = vmand %vm2039_vm6, %vm2881_vm13  ;;  %v2141_v52 = vsel %vm537_vm14, %v239_v56, -1e+30  ;;  %613 = vmax.xlane.f32.xlu1 %v2128_v17  ;;  %vm488_vm6 = vcmp.ne.s32.totalorder %v467_v37, %v1722_v27 }
  0xf2   :  { %vm2884_vm10 = vmand %vm2026_vm2, %vm1727_vm15  ;;  %611 = vmax.xlane.f32.xlu0 %v2141_v52  ;;  %vm2885_vm2 = vcmp.eq.s32.totalorder %v1651_v2, %v1665_v6 }
  0xf3   :  { %v2150_v20 = vsel %vm2884_vm10, %v2114_v5, -1e+30  ;;  %vm539_vm7 = vmand %vm2071_vm3, %vm1727_vm15 }
  0xf4   :  { %609 = vmax.xlane.f32.xlu2 %v2150_v20  ;;  %vm522_vm9 = vmand %vm2062_vm1, %vm489_vm11  ;;  %v2205_v57 = vsel %vm539_vm7, %v241_v18, -1e+30 }
  0xf5   :  { %vm2165_vm14 = vmand %vm2885_vm2, %vm489_vm11  ;;  %vm2888_vm2 = vcmp.eq.s32.totalorder %v1683_v12, %v1665_v6 }
  0xf6   :  { %vm521_vm13 = vmand %vm2098_vm5, %vm488_vm6 }
  0xf7   :  { %vm541_vm10 = vmand %vm522_vm9, %vm1727_vm15  ;;  %vm2891_vm9 = vcmp.eq.s32.totalorder %v1697_v16, %v1665_v6 }
  0xf8   :  { %v2180_v2 = vsel %vm541_vm10, %v243_v7, -1e+30  ;;  %vm540_vm11 = vmand %vm521_vm13, %vm1727_vm15 }
  0xf9   :  { %v2184_v42 = vsel %vm540_vm11, %v242_v28, -1e+30  ;;  %vm542_vm5 = vmand %vm2137_vm12, %vm1727_vm15  ;;  %619 = vmax.xlane.f32.xlu1 %v2180_v2  ;;  %vm2903_vm12 = vcmp.ne.s32.totalorder %v1769_v53, %v1722_v27 }
  0xfa   :  { %vm2195_vm1 = vmand %vm2888_vm2, %vm485_vm4  ;;  %617 = vmax.xlane.f32.xlu0 %v2184_v42  ;;  %vm34_vm4 = vcmask 7168  }
  0xfb   :  { %vm2212_vm13 = vmand %vm2891_vm9, %vm488_vm6  ;;  %35 = vst.msk [vmem:[#allocation2] sm:$0xff] %vm34_vm4, %v1409_v29  ;;  %vm2894_vm6 = vnez %v2841_v63 }
  0xfc   :  { %615 = vmax.xlane.f32.xlu2 %v2205_v57  ;;  %vm570_vm3 = vmand %vm2105_vm0, %vm1727_vm15  ;;  %36 = vst.msk [vmem:[#allocation2 + $0x8] sm:$0xff] %vm34_vm4, %v1409_v29  ;;  %vm2895_vm0 = vnez %v2852_v14 }
  0xfd   :  { %v2224_v16 = vsel %vm570_vm3, %v240_v23, 0.0  ;;  %vm571_vm7 = vmand %vm2894_vm6, %vm1727_vm15  ;;  %37 = vst.msk [vmem:[#allocation2 + $0x10] sm:$0xff] %vm34_vm4, %v1409_v29  ;;  %vm2897_vm3 = vcmp.ne.s32.totalorder %v1738_v35, %v1722_v27 }
  0xfe   :  { %v2231_v26 = vsel %vm571_vm7, %v241_v18, 0.0  ;;  %vm569_vm10 = vmand %vm2195_vm1, %vm1727_vm15  ;;  %38 = vst.msk [vmem:[#allocation2 + $0x18] sm:$0xff] %vm34_vm4, %v1409_v29 }
  0xff   :  { %v2238_v43 = vsel %vm569_vm10, %v239_v56, 0.0  ;;  %vm574_vm11 = vmand %vm2895_vm0, %vm1727_vm15  ;;  %39 = vst.msk [vmem:[#allocation2 + $0x20] sm:$0xff] %vm34_vm4, %v1409_v29 }
 0x100   :  { %v2245_v63 = vsel %vm574_vm11, %v244_v24, 0.0  ;;  %vm572_vm2 = vmand %vm2212_vm13, %vm1727_vm15  ;;  %40 = vst.msk [vmem:[#allocation2 + $0x28] sm:$0xff] %vm34_vm4, %v1409_v29  ;;  %vm2898_vm13 = vcmp.eq.s32.totalorder %v1653_v3, %v1665_v6 }
 0x101   :  { %vm2896_vm1 = vmand %vm2122_vm8, %vm1727_vm15  ;;  %v2258_v14 = vsel %vm572_vm2, %v242_v28, 0.0  ;;  %41 = vst.msk [vmem:[#allocation2 + $0x30] sm:$0xff] %vm34_vm4, %v1409_v29  ;;  %vm2901_vm8 = vcmp.ne.s32.totalorder %v1848_v11, %v1722_v27 }
 0x102   :  { %v946_v23 = vsel %vm2896_vm1, %v1808_v58, 0.0  ;;  %vm573_vm9 = vmand %vm2165_vm14, %vm1727_vm15  ;;  %v2279_v58 = vsel %vm542_vm5, %v244_v24, -1e+30  ;;  %vm2902_vm14 = vcmp.eq.s32.totalorder %v1616_v51, %v1665_v6  ;;  %960 = vadd.xlane.f32.xlu0 %v1740_v36  ;;  %42 = vst.msk [vmem:[#allocation2 + $0x38] sm:$0xff] %vm34_vm4, %v1409_v29  ;;  %vm2904_vm5 = vcmp.eq.s32.totalorder %v1655_v4, %v1665_v6 }
 0x103   :  { %vm2270_vm6 = vmand %vm2898_vm13, %vm2897_vm3  ;;  %964 = vadd.xlane.f32.xlu1 %v946_v23  ;;  %v2282_v56 = vsel %vm573_vm9, %v243_v7, 0.0  ;;  %43 = vst.msk [vmem:[#allocation2 + $0x40] sm:$0xff] %vm34_vm4, %v1409_v29  ;;  %vm2905_vm1 = vcmp.ne.s32.totalorder %v1742_v39, %v1722_v27  ;;  %vm2906_vm9 = vcmp.eq.s32.totalorder %v1671_v9, %v1665_v6  ;;  %vm2909_vm13 = vcmp.ne.s32.totalorder %v1950_v40, %v1722_v27  ;;  %v2369_v39 = vld [vmem:[#allocation2] sm:$0xff]  ;;  %v2408_v33 = vld [vmem:[#allocation2 + $0x8] sm:$0xff] }
 0x104   :  { %vm548_vm7 = vmand %vm2902_vm14, %vm2901_vm8  ;;  %621 = vmax.xlane.f32.xlu2 %v2279_v58  ;;  %44 = vst.msk [vmem:[#allocation2 + $0x48] sm:$0xff] %vm34_vm4, %v1409_v29  ;;  %vm2911_vm14 = vcmp.ne.s32.totalorder %v1850_v15, %v1722_v27  ;;  %v2411_v53 = vld [vmem:[#allocation2 + $0x10] sm:$0xff] }
 0x105   :  { %vm544_vm10 = vmand %vm2904_vm5, %vm2903_vm12  ;;  %45 = vst.msk [vmem:[#allocation2 + $0x50] sm:$0xff] %vm34_vm4, %v1409_v29 }
 0x106   :  { %vm562_vm0 = vmand %vm2270_vm6, %vm1727_vm15  ;;  %46 = vst.msk [vmem:[#allocation2 + $0x58] sm:$0xff] %vm34_vm4, %v1409_v29  ;;  %vm2910_vm6 = vcmp.eq.s32.totalorder %v1627_v55, %v1665_v6 }
 0x107   :  { %vm564_vm11 = vmand %vm548_vm7, %vm1727_vm15  ;;  %47 = vst.msk [vmem:[#allocation2 + $0x60] sm:$0xff] %vm34_vm4, %v1409_v29  ;;  %v947_v4 = vsel %vm562_vm0, %v1907_v30, 0.0  ;;  %vm2912_vm7 = vcmp.eq.s32.totalorder %v1605_v47, %v1665_v6  ;;  %v2429_v40 = vld [vmem:[#allocation2 + $0x28] sm:$0xff] }
 0x108   :  { %vm560_vm2 = vmand %vm544_vm10, %vm1727_vm15  ;;  %v949_v51 = vsel %vm564_vm11, %v1918_v32, 0.0  ;;  %48 = vst.msk [vmem:[#allocation2 + $0x68] sm:$0xff] %vm34_vm4, %v1409_v29  ;;  %vm2913_vm11 = vcmp.ne.s32.totalorder %v1750_v44, %v1722_v27  ;;  %v2461_v25 = vld [vmem:[#allocation2 + $0x30] sm:$0xff] }
 0x109   :  { %vm2320_vm3 = vmand %vm2906_vm9, %vm2905_vm1  ;;  %v945_v35 = vsel %vm560_vm2, %v1817_v62, 0.0  ;;  %49 = vst.msk [vmem:[#allocation2 + $0x70] sm:$0xff] %vm34_vm4, %v1409_v29  ;;  %vm2914_vm2 = vcmp.eq.s32.totalorder %v1685_v13, %v1665_v6  ;;  %vm2915_vm9 = vcmp.ne.s32.totalorder %v1952_v41, %v1722_v27  ;;  %v2431_v41 = vld [vmem:[#allocation2 + $0x20] sm:$0xff]  ;;  %v2459_v50 = vld [vmem:[#allocation2 + $0x38] sm:$0xff] }
 0x10a   :  { %vm551_vm8 = vmand %vm2910_vm6, %vm2909_vm13  ;;  %966 = vadd.xlane.f32.xlu0 %v947_v4  ;;  %50 = vst.msk [vmem:[#allocation2 + $0x78] sm:$0xff] %vm34_vm4, %v1409_v29  ;;  %v2457_v28 = vld [vmem:[#allocation2 + $0x40] sm:$0xff] }
 0x10b   :  { %970 = vadd.xlane.f32.xlu1 %v949_v51  ;;  %vm547_vm12 = vmand %vm2912_vm7, %vm2911_vm14  ;;  %2917 = vst [vmem:[#allocation5_spill] sm:$0xff] %v2459_v50 }
 0x10c   :  { %962 = vadd.xlane.f32.xlu2 %v945_v35  ;;  %vm565_vm5 = vmand %vm2320_vm3, %vm1727_vm15  ;;  %vm2916_vm3 = vcmp.eq.s32.totalorder %v1669_v8, %v1665_v6  ;;  %v1410_v6 = vmov 0.0  }
 0x10d   :  { %vm567_vm10 = vmand %vm551_vm8, %vm1727_vm15  ;;  %v950_v9 = vsel %vm565_vm5, %v2016_v19, 0.0  ;;  %69 = vst.msk [vmem:[#allocation4 + $0x10] sm:$0xff] %vm34_vm4, %v1410_v6  ;;  %v2433_v19 = vld [vmem:[#allocation2 + $0x18] sm:$0xff] }
 0x10e   :  { %vm563_vm0 = vmand %vm547_vm12, %vm1727_vm15  ;;  %v952_v55 = vsel %vm567_vm10, %v2019_v61, 0.0  ;;  %51 = vst.msk [vmem:[#allocation3] sm:$0xff] %vm34_vm4, %v1410_v6 }
 0x10f   :  { %v948_v36 = vsel %vm563_vm0, %v1935_v0, 0.0  ;;  %vm552_vm1 = vmand %vm2914_vm2, %vm2913_vm11  ;;  %52 = vst.msk [vmem:[#allocation3 + $0x8] sm:$0xff] %vm34_vm4, %v1410_v6 }
 0x110   :  { %vm550_vm13 = vmand %vm2916_vm3, %vm2915_vm9  ;;  %53 = vst.msk [vmem:[#allocation3 + $0x10] sm:$0xff] %vm34_vm4, %v1410_v6 }
 0x111   :  { %vm568_vm6 = vmand %vm552_vm1, %vm1727_vm15  ;;  %54 = vst.msk [vmem:[#allocation3 + $0x18] sm:$0xff] %vm34_vm4, %v1410_v6  ;;  %v2544_v35 = vld [vmem:[#allocation2 + $0x78] sm:$0xff] }
 0x112   :  { %972 = vadd.xlane.f32.xlu0 %v950_v9  ;;  %vm566_vm8 = vmand %vm550_vm13, %vm1727_vm15  ;;  %v953_v47 = vsel %vm568_vm6, %v2114_v5, 0.0  ;;  %55 = vst.msk [vmem:[#allocation3 + $0x20] sm:$0xff] %vm34_vm4, %v1410_v6  ;;  %v2488_v9 = vld [vmem:[#allocation2 + $0x50] sm:$0xff] }
 0x113   :  { %976 = vadd.xlane.f32.xlu1 %v952_v55  ;;  %v951_v13 = vsel %vm566_vm8, %v2032_v46, 0.0  ;;  %56 = vst.msk [vmem:[#allocation3 + $0x28] sm:$0xff] %vm34_vm4, %v1410_v6  ;;  %v2486_v55 = vld [vmem:[#allocation2 + $0x58] sm:$0xff] }
 0x114   :  { %968 = vadd.xlane.f32.xlu2 %v948_v36  ;;  %57 = vst.msk [vmem:[#allocation3 + $0x30] sm:$0xff] %vm34_vm4, %v1410_v6  ;;  %v2490_v36 = vld [vmem:[#allocation2 + $0x48] sm:$0xff] }
 0x115   :  { %58 = vst.msk [vmem:[#allocation3 + $0x38] sm:$0xff] %vm34_vm4, %v1410_v6 }
 0x116   :  { %59 = vst.msk [vmem:[#allocation3 + $0x40] sm:$0xff] %vm34_vm4, %v1410_v6 }
 0x117   :  { %60 = vst.msk [vmem:[#allocation3 + $0x48] sm:$0xff] %vm34_vm4, %v1410_v6 }
 0x118   :  { %61 = vst.msk [vmem:[#allocation3 + $0x50] sm:$0xff] %vm34_vm4, %v1410_v6 }
 0x119   :  { %62 = vst.msk [vmem:[#allocation3 + $0x58] sm:$0xff] %vm34_vm4, %v1410_v6 }
 0x11a   :  { %978 = vadd.xlane.f32.xlu0 %v953_v47  ;;  %63 = vst.msk [vmem:[#allocation3 + $0x60] sm:$0xff] %vm34_vm4, %v1410_v6 }
 0x11b   :  { %64 = vst.msk [vmem:[#allocation3 + $0x68] sm:$0xff] %vm34_vm4, %v1410_v6 }
 0x11c   :  { %974 = vadd.xlane.f32.xlu2 %v951_v13  ;;  %65 = vst.msk [vmem:[#allocation3 + $0x70] sm:$0xff] %vm34_vm4, %v1410_v6 }
 0x11d   :  { %66 = vst.msk [vmem:[#allocation3 + $0x78] sm:$0xff] %vm34_vm4, %v1410_v6 }
 0x11e   :  { %67 = vst.msk [vmem:[#allocation4] sm:$0xff] %vm34_vm4, %v1410_v6 }
 0x11f   :  { %68 = vst.msk [vmem:[#allocation4 + $0x8] sm:$0xff] %vm34_vm4, %v1410_v6 }
 0x120   :  { %70 = vst.msk [vmem:[#allocation4 + $0x18] sm:$0xff] %vm34_vm4, %v1410_v6 }
 0x121   :  { %71 = vst.msk [vmem:[#allocation4 + $0x20] sm:$0xff] %vm34_vm4, %v1410_v6 }
 0x122   :  { %72 = vst.msk [vmem:[#allocation4 + $0x28] sm:$0xff] %vm34_vm4, %v1410_v6 }
 0x123   :  { %73 = vst.msk [vmem:[#allocation4 + $0x30] sm:$0xff] %vm34_vm4, %v1410_v6 }
 0x124   :  { %74 = vst.msk [vmem:[#allocation4 + $0x38] sm:$0xff] %vm34_vm4, %v1410_v6 }
 0x125   :  { %v592_v44 = vpop.xlane.xlu0 %591  ;;  %75 = vst.msk [vmem:[#allocation4 + $0x40] sm:$0xff] %vm34_vm4, %v1410_v6  ;;  %v928_v18 = vld [vmem:[#allocation4] sm:$0xff] }
 0x126   :  { %v2372_v27 = vmax.f32 %v2369_v39, %v592_v44  ;;  %76 = vst.msk [vmem:[#allocation4 + $0x48] sm:$0xff] %vm34_vm4, %v1410_v6 }
 0x127   :  { %77 = vst.msk [vmem:[#allocation4 + $0x50] sm:$0xff] %vm34_vm4, %v1410_v6 }
 0x128   :  { %1024 = vst.msk [vmem:[#allocation2] sm:$0xff] %vm34_vm4, %v2372_v27 }
 0x129   :  { %78 = vst.msk [vmem:[#allocation4 + $0x58] sm:$0xff] %vm34_vm4, %v1410_v6 }
 0x12a   :  { %79 = vst.msk [vmem:[#allocation4 + $0x60] sm:$0xff] %vm34_vm4, %v1410_v6 }
 0x12b   :  { %80 = vst.msk [vmem:[#allocation4 + $0x68] sm:$0xff] %vm34_vm4, %v1410_v6 }
 0x12c   :  { %81 = vst.msk [vmem:[#allocation4 + $0x70] sm:$0xff] %vm34_vm4, %v1410_v6 }
 0x12d   :  { %82 = vst.msk [vmem:[#allocation4 + $0x78] sm:$0xff] %vm34_vm4, %v1410_v6 }
 0x12e   :  { %705 = vperm.xlu0 %1290, %v2372_v27   ;;  %2919 = vst [vmem:[#allocation7_spill] sm:$0xff] %v2486_v55 }
 0x12f   :  { %2921 = vst [vmem:[#allocation9_spill] sm:$0xff] %v2544_v35 }
 0x147   :  { %v594_v62 = vpop.xlane.xlu1 %593 }
 0x148   :  { %v2416_v11 = vmax.f32 %v2408_v33, %v594_v62  ;;  %v596_v15 = vpop.xlane.xlu2 %595 }
 0x149   :  { %v2419_v30 = vmax.f32 %v2411_v53, %v596_v15 }
 0x14a   :  { %1025 = vst.msk [vmem:[#allocation2 + $0x8] sm:$0xff] %vm34_vm4, %v2416_v11 }
 0x14b   :  { %1026 = vst.msk [vmem:[#allocation2 + $0x10] sm:$0xff] %vm34_vm4, %v2419_v30 }
 0x150   :  { %v602_v61 = vpop.xlane.xlu1 %601 }
 0x151   :  { %v2436_v46 = vmax.f32 %v2429_v40, %v602_v61  ;;  %v600_v5 = vpop.xlane.xlu0 %599 }
 0x152   :  { %v2439_v1 = vmax.f32 %v2431_v41, %v600_v5 }
 0x153   :  { %1029 = vst.msk [vmem:[#allocation2 + $0x28] sm:$0xff] %vm34_vm4, %v2436_v46 }
 0x154   :  { %v598_v60 = vpop.xlane.xlu2 %597  ;;  %1028 = vst.msk [vmem:[#allocation2 + $0x20] sm:$0xff] %vm34_vm4, %v2439_v1  ;;  %725 = vperm.xlu1 %1291, %v2439_v1  }
 0x155   :  { %v2442_v37 = vmax.f32 %v2433_v19, %v598_v60 }
 0x157   :  { %1027 = vst.msk [vmem:[#allocation2 + $0x18] sm:$0xff] %vm34_vm4, %v2442_v37 }
 0x159   :  { %v608_v12 = vpop.xlane.xlu1 %607 }
 0x15a   :  { %v2464_v24 = vmax.f32 %v2457_v28, %v608_v12  ;;  %v2514_v12 = vld [vmem:[#allocation2 + $0x70] sm:$0xff] }
 0x15b   :  { %v606_v29 = vpop.xlane.xlu0 %605 }
 0x15c   :  { %v2467_v59 = vmax.f32 %v2459_v50, %v606_v29  ;;  %1032 = vst.msk [vmem:[#allocation2 + $0x40] sm:$0xff] %vm34_vm4, %v2464_v24  ;;  %745 = vperm.xlu0 %1290, %v2464_v24   ;;  %710 = vperm.xlu1 %1291, %v2416_v11   ;;  %v2516_v29 = vld [vmem:[#allocation2 + $0x68] sm:$0xff] }
 0x15e   :  { %v604_v23 = vpop.xlane.xlu2 %603  ;;  %2918 = vst [vmem:[#allocation6_spill] sm:$0xff] %v2467_v59 }
 0x15f   :  { %v2470_v51 = vmax.f32 %v2461_v25, %v604_v23  ;;  %1031 = vst.msk [vmem:[#allocation2 + $0x38] sm:$0xff] %vm34_vm4, %v2467_v59  ;;  %v2518_v23 = vld [vmem:[#allocation2 + $0x60] sm:$0xff] }
 0x161   :  { %1030 = vst.msk [vmem:[#allocation2 + $0x30] sm:$0xff] %vm34_vm4, %v2470_v51 }
 0x164   :  { %v614_v47 = vpop.xlane.xlu1 %613  ;;  %730 = vperm.xlu0 %1290, %v2436_v46  }
 0x165   :  { %v2493_v13 = vmax.f32 %v2486_v55, %v614_v47  ;;  %v612_v44 = vpop.xlane.xlu0 %611 }
 0x166   :  { %v2496_v62 = vmax.f32 %v2488_v9, %v612_v44 }
 0x167   :  { %2920 = vst [vmem:[#allocation8_spill] sm:$0xff] %v2493_v13  ;;  %v610_v6 = vpop.xlane.xlu2 %609 }
 0x168   :  { %v2499_v15 = vmax.f32 %v2490_v36, %v610_v6  ;;  %1035 = vst.msk [vmem:[#allocation2 + $0x58] sm:$0xff] %vm34_vm4, %v2493_v13 }
 0x169   :  { %1034 = vst.msk [vmem:[#allocation2 + $0x50] sm:$0xff] %vm34_vm4, %v2496_v62 }
 0x16a   :  { %1033 = vst.msk [vmem:[#allocation2 + $0x48] sm:$0xff] %vm34_vm4, %v2499_v15 }
 0x16c   :  { %v620_v47 = vpop.xlane.xlu1 %619 }
 0x16d   :  { %v2521_v44 = vmax.f32 %v2514_v12, %v620_v47  ;;  %v618_v6 = vpop.xlane.xlu0 %617 }
 0x16e   :  { %v2524_v4 = vmax.f32 %v2516_v29, %v618_v6  ;;  %v934_v6 = vld [vmem:[#allocation4 + $0x30] sm:$0xff] }
 0x16f   :  { %v616_v61 = vpop.xlane.xlu2 %615  ;;  %1038 = vst.msk [vmem:[#allocation2 + $0x70] sm:$0xff] %vm34_vm4, %v2521_v44  ;;  %775 = vperm.xlu0 %1290, %v2521_v44  }
 0x170   :  { %v2527_v5 = vmax.f32 %v2518_v23, %v616_v61  ;;  %1037 = vst.msk [vmem:[#allocation2 + $0x68] sm:$0xff] %vm34_vm4, %v2524_v4  ;;  %770 = vperm.xlu1 %1291, %v2524_v4   ;;  %v930_v61 = vld [vmem:[#allocation4 + $0x10] sm:$0xff] }
 0x172   :  { %765 = vperm.xlu2 %1292, %v2527_v5   ;;  %1036 = vst.msk [vmem:[#allocation2 + $0x60] sm:$0xff] %vm34_vm4, %v2527_v5 }
 0x175   :  { %v961_v47 = vpop.xlane.xlu0 %960 }
 0x176   :  { %v965_v0 = vpop.xlane.xlu1 %964  ;;  %v992_v32 = vadd.f32 %v961_v47, %v928_v18  ;;  %v931_v18 = vld [vmem:[#allocation4 + $0x18] sm:$0xff] }
 0x177   :  { %v994_v7 = vadd.f32 %v965_v0, %v930_v61  ;;  %v622_v60 = vpop.xlane.xlu2 %621  ;;  %720 = vperm.xlu0 %1290, %v2442_v37   ;;  %v933_v0 = vld [vmem:[#allocation4 + $0x28] sm:$0xff] }
 0x178   :  { %v2547_v3 = vmax.f32 %v2544_v35, %v622_v60  ;;  %1008 = vst.msk [vmem:[#allocation4] sm:$0xff] %vm34_vm4, %v992_v32  ;;  %755 = vperm.xlu1 %1291, %v2496_v62   ;;  %v929_v60 = vld [vmem:[#allocation4 + $0x8] sm:$0xff]  ;;  %v936_v32 = vld [vmem:[#allocation4 + $0x40] sm:$0xff] }
 0x179   :  { %1010 = vst.msk [vmem:[#allocation4 + $0x10] sm:$0xff] %vm34_vm4, %v994_v7  ;;  %v932_v35 = vld [vmem:[#allocation4 + $0x20] sm:$0xff] }
 0x17a   :  { %750 = vperm.xlu2 %1292, %v2499_v15   ;;  %1039 = vst.msk [vmem:[#allocation2 + $0x78] sm:$0xff] %vm34_vm4, %v2547_v3 }
 0x17d   :  { %v967_v7 = vpop.xlane.xlu0 %966 }
 0x17e   :  { %v971_v47 = vpop.xlane.xlu1 %970  ;;  %v995_v8 = vadd.f32 %v967_v7, %v931_v18 }
 0x17f   :  { %v997_v61 = vadd.f32 %v971_v47, %v933_v0  ;;  %v963_v22 = vpop.xlane.xlu2 %962  ;;  %760 = vperm.xlu0 %1290, %v2493_v13  }
 0x180   :  { %v993_v55 = vadd.f32 %v963_v22, %v929_v60  ;;  %1011 = vst.msk [vmem:[#allocation4 + $0x18] sm:$0xff] %vm34_vm4, %v995_v8  ;;  %740 = vperm.xlu1 %1291, %v2467_v59   ;;  %v937_v8 = vld [vmem:[#allocation4 + $0x48] sm:$0xff] }
 0x181   :  { %1013 = vst.msk [vmem:[#allocation4 + $0x28] sm:$0xff] %vm34_vm4, %v997_v61  ;;  %v935_v61 = vld [vmem:[#allocation4 + $0x38] sm:$0xff] }
 0x182   :  { %715 = vperm.xlu2 %1292, %v2419_v30   ;;  %1009 = vst.msk [vmem:[#allocation4 + $0x8] sm:$0xff] %vm34_vm4, %v993_v55 }
 0x185   :  { %v973_v50 = vpop.xlane.xlu0 %972 }
 0x186   :  { %v977_v0 = vpop.xlane.xlu1 %976  ;;  %v998_v22 = vadd.f32 %v973_v50, %v934_v6 }
 0x187   :  { %v1000_v47 = vadd.f32 %v977_v0, %v936_v32  ;;  %v969_v18 = vpop.xlane.xlu2 %968 }
 0x188   :  { %v996_v60 = vadd.f32 %v969_v18, %v932_v35  ;;  %1014 = vst.msk [vmem:[#allocation4 + $0x30] sm:$0xff] %vm34_vm4, %v998_v22 }
 0x189   :  { %1016 = vst.msk [vmem:[#allocation4 + $0x40] sm:$0xff] %vm34_vm4, %v1000_v47 }
 0x18a   :  { %735 = vperm.xlu2 %1292, %v2470_v51   ;;  %1012 = vst.msk [vmem:[#allocation4 + $0x20] sm:$0xff] %vm34_vm4, %v996_v60 }
 0x18d   :  { %v979_v55 = vpop.xlane.xlu0 %978 }
 0x18e   :  { %v1001_v13 = vadd.f32 %v979_v55, %v937_v8 }
 0x18f   :  { %v975_v7 = vpop.xlane.xlu2 %974 }
 0x190   :  { %v999_v59 = vadd.f32 %v975_v7, %v935_v61  ;;  %1017 = vst.msk [vmem:[#allocation4 + $0x48] sm:$0xff] %vm34_vm4, %v1001_v13 }
 0x192   :  { %780 = vperm.xlu2 %1292, %v2547_v3   ;;  %1015 = vst.msk [vmem:[#allocation4 + $0x38] sm:$0xff] %vm34_vm4, %v999_v59 }
 0x1a0   :  { %v706_v50 = vpop.permute.xlu0 %705 }
 0x1a1   :  { %v783_v35 = vsub.f32 %v1733_v34, %v706_v50 }
 0x1a3   :  { %v799_v6 = vmul.f32 1.442695, %v783_v35 }
 0x1a5   :  { %1296 = vpow2.f32 %v799_v6 }
 0x1a9   :  { %984 = vadd.xlane.f32.xlu0 %v2231_v26 }
 0x1aa   :  { %982 = vadd.xlane.f32.xlu1 %v2224_v16 }
 0x1ab   :  { %v1297_v32 = vpop.eup %1296 }
 0x1b2   :  { %863 = vadd.xlane.f32.xlu1 %v1297_v32 }
 0x1bb   :  { %980 = vadd.xlane.f32.xlu2 %v2238_v43 }
 0x1c6   :  { %v726_v0 = vpop.permute.xlu1 %725 }
 0x1c7   :  { %v787_v13 = vsub.f32 %v1970_v49, %v726_v0 }
 0x1c9   :  { %v807_v59 = vmul.f32 1.442695, %v787_v13 }
 0x1cb   :  { %1298 = vpow2.f32 %v807_v59 }
 0x1cc   :  { %v766_v47 = vpop.permute.xlu2 %765 }
 0x1cd   :  { %v795_v18 = vsub.f32 %v2205_v57, %v766_v47 }
 0x1ce   :  { %v746_v34 = vpop.permute.xlu0 %745  ;;  %v711_v60 = vpop.permute.xlu1 %710 }
 0x1cf   :  { %v823_v22 = vmul.f32 1.442695, %v795_v18  ;;  %v791_v26 = vsub.f32 %v2044_v48, %v746_v34  ;;  %v784_v8 = vsub.f32 %v1842_v10, %v711_v60 }
 0x1d1   :  { %1300 = vpow2.f32 %v823_v22  ;;  %v815_v43 = vmul.f32 1.442695, %v791_v26  ;;  %v1299_v55 = vpop.eup %1298  ;;  %v801_v7 = vmul.f32 1.442695, %v784_v8 }
 0x1d2   :  { %871 = vadd.xlane.f32.xlu0 %v1299_v55 }
 0x1d3   :  { %1302 = vpow2.f32 %v815_v43 }
 0x1d4   :  { %v751_v16 = vpop.permute.xlu2 %750  ;;  %1304 = vpow2.f32 %v801_v7 }
 0x1d5   :  { %v792_v61 = vsub.f32 %v2150_v20, %v751_v16 }
 0x1d6   :  { %v731_v57 = vpop.permute.xlu0 %730 }
 0x1d7   :  { %v817_v50 = vmul.f32 1.442695, %v792_v61  ;;  %v1301_v49 = vpop.eup %1300  ;;  %v788_v35 = vsub.f32 %v1944_v38, %v731_v57 }
 0x1d8   :  { %887 = vadd.xlane.f32.xlu1 %v1301_v49 }
 0x1d9   :  { %1306 = vpow2.f32 %v817_v50  ;;  %v1303_v48 = vpop.eup %1302  ;;  %v809_v32 = vmul.f32 1.442695, %v788_v35 }
 0x1da   :  { %v1305_v0 = vpop.eup %1304  ;;  %879 = vadd.xlane.f32.xlu2 %v1303_v48 }
 0x1db   :  { %1308 = vpow2.f32 %v809_v32  ;;  %865 = vadd.xlane.f32.xlu0 %v1305_v0 }
 0x1dc   :  { %v716_v6 = vpop.permute.xlu2 %715 }
 0x1dd   :  { %v785_v20 = vsub.f32 %v1860_v21, %v716_v6 }
 0x1df   :  { %v1307_v10 = vpop.eup %1306  ;;  %v803_v13 = vmul.f32 1.442695, %v785_v20 }
 0x1e0   :  { %881 = vadd.xlane.f32.xlu1 %v1307_v10 }
 0x1e1   :  { %v776_v47 = vpop.permute.xlu0 %775  ;;  %v1309_v38 = vpop.eup %1308  ;;  %1310 = vpow2.f32 %v803_v13 }
 0x1e2   :  { %v771_v18 = vpop.permute.xlu1 %770  ;;  %v797_v26 = vsub.f32 %v2180_v2, %v776_v47  ;;  %873 = vadd.xlane.f32.xlu2 %v1309_v38 }
 0x1e3   :  { %v796_v22 = vsub.f32 %v2184_v42, %v771_v18 }
 0x1e4   :  { %v736_v59 = vpop.permute.xlu2 %735  ;;  %v827_v21 = vmul.f32 1.442695, %v797_v26 }
 0x1e5   :  { %v789_v34 = vsub.f32 %v2082_v31, %v736_v59  ;;  %v825_v60 = vmul.f32 1.442695, %v796_v22  ;;  %v940_v59 = vld [vmem:[#allocation4 + $0x60] sm:$0xff]  ;;  %v939_v22 = vld [vmem:[#allocation4 + $0x58] sm:$0xff] }
 0x1e7   :  { %v811_v16 = vmul.f32 1.442695, %v789_v34  ;;  %1312 = vpow2.f32 %v825_v60  ;;  %v1311_v7 = vpop.eup %1310 }
 0x1e9   :  { %1314 = vpow2.f32 %v811_v16  ;;  %v721_v8 = vpop.permute.xlu0 %720  ;;  %v831_v16 = vld [vmem:[#allocation3] sm:$0xff] }
 0x1ea   :  { %v756_v61 = vpop.permute.xlu1 %755  ;;  %v786_v43 = vsub.f32 %v1978_v54, %v721_v8  ;;  %1316 = vpow2.f32 %v827_v21  ;;  %867 = vadd.xlane.f32.xlu2 %v1311_v7  ;;  %v1059_v7 = vld [vmem:[#allocation2] sm:$0xff] }
 0x1eb   :  { %v793_v55 = vsub.f32 %v2141_v52, %v756_v61 }
 0x1ec   :  { %v805_v42 = vmul.f32 1.442695, %v786_v43  ;;  %v781_v49 = vpop.permute.xlu2 %780  ;;  %v1043_v43 = vld [vmem:[#allocation4] sm:$0xff] }
 0x1ed   :  { %v1313_v50 = vpop.eup %1312  ;;  %v819_v31 = vmul.f32 1.442695, %v793_v55  ;;  %v798_v57 = vsub.f32 %v2279_v58, %v781_v49  ;;  %v1392_v49 = vld [vmem:[%s2793_s0] sm:$0xff] }
 0x1ee   :  { %1318 = vpow2.f32 %v805_v42  ;;  %889 = vadd.xlane.f32.xlu0 %v1313_v50  ;;  %v1075_v42 = vsub.f32 %v1043_v43, %v1059_v7  ;;  %vm1171_vm15 = vcmp.lt.s32.totalorder %v1392_v49, 16 }
 0x1ef   :  { %v1315_v2 = vpop.eup %1314  ;;  %1320 = vpow2.f32 %v819_v31  ;;  %v829_v0 = vmul.f32 1.442695, %v798_v57 }
 0x1f0   :  { %875 = vadd.xlane.f32.xlu1 %v1315_v2  ;;  %v1317_v48 = vpop.eup %1316  ;;  %v2923_v2 = vsub.f32 %v2431_v41, %v2439_v1  ;;  %v2926_v41 = vsub.f32 %v2408_v33, %v2416_v11 }
 0x1f1   :  { %v761_v35 = vpop.permute.xlu0 %760 }
 0x1f2   :  { %v741_v6 = vpop.permute.xlu1 %740  ;;  %v794_v54 = vsub.f32 %v2128_v17, %v761_v35  ;;  %891 = vadd.xlane.f32.xlu2 %v1317_v48  ;;  %v679_v57 = vmul.f32 1.442695, %v2923_v2  ;;  %v673_v1 = vmul.f32 1.442695, %v2926_v41  ;;  %v1063_v2 = vld [vmem:[#allocation2 + $0x20] sm:$0xff] }
 0x1f3   :  { %v790_v52 = vsub.f32 %v2053_v45, %v741_v6  ;;  %v2922_v45 = vsub.f32 %v2369_v39, %v2372_v27  ;;  %v938_v39 = vld [vmem:[#allocation4 + $0x50] sm:$0xff]  ;;  %v2924_v6 = vsub.f32 %v2518_v23, %v2527_v5  ;;  %v2927_v5 = vsub.f32 %v2490_v36, %v2499_v15  ;;  %v839_v36 = vld [vmem:[#allocation3 + $0x40] sm:$0xff] }
 0x1f4   :  { %v1319_v32 = vpop.eup %1318  ;;  %v821_v10 = vmul.f32 1.442695, %v794_v54 }
 0x1f5   :  { %v1321_v20 = vpop.eup %1320  ;;  %v813_v47 = vmul.f32 1.442695, %v790_v52  ;;  %v671_v17 = vmul.f32 1.442695, %v2922_v45  ;;  %v695_v54 = vmul.f32 1.442695, %v2924_v6  ;;  %v2925_v52 = vsub.f32 %v2457_v28, %v2464_v24 }
 0x1f6   :  { %1322 = vpow2.f32 %v821_v10  ;;  %883 = vadd.xlane.f32.xlu0 %v1321_v20  ;;  %v689_v23 = vmul.f32 1.442695, %v2927_v5  ;;  %v835_v10 = vld [vmem:[#allocation3 + $0x20] sm:$0xff]  ;;  %v2928_v28 = vsub.f32 %v2429_v40, %v2436_v46  ;;  %v2934_v6 = vsub.f32 %v2514_v12, %v2521_v44  ;;  %v833_v12 = vld [vmem:[#allocation3 + $0x10] sm:$0xff] }
 0x1f7   :  { %1324 = vpow2.f32 %v813_v47  ;;  %v843_v47 = vld [vmem:[#allocation3 + $0x60] sm:$0xff] }
 0x1f8   :  { %869 = vadd.xlane.f32.xlu1 %v1319_v32  ;;  %1326 = vpow2.f32 %v829_v0  ;;  %v687_v32 = vmul.f32 1.442695, %v2925_v52  ;;  %v681_v24 = vmul.f32 1.442695, %v2928_v28 }
 0x1f9   :  { %1328 = vpow2.f32 %v671_v17 }
 0x1fc   :  { %v1323_v13 = vpop.eup %1322 }
 0x1fd   :  { %v1325_v58 = vpop.eup %1324  ;;  %885 = vadd.xlane.f32.xlu2 %v1323_v13 }
 0x1fe   :  { %v1327_v18 = vpop.eup %1326  ;;  %877 = vadd.xlane.f32.xlu0 %v1325_v58 }
 0x200   :  { %893 = vadd.xlane.f32.xlu1 %v1327_v18 }
 0x205   :  { %986 = vadd.xlane.f32.xlu2 %v2258_v14  ;;  %v1329_v14 = vpop.eup %1328 }
 0x206   :  { %990 = vadd.xlane.f32.xlu0 %v2245_v63  ;;  %v847_v63 = vmul.f32 %v1329_v14, %v831_v16  ;;  %v2929_v16 = vsub.f32 %v2411_v53, %v2419_v30  ;;  %v836_v53 = vld [vmem:[#allocation3 + $0x28] sm:$0xff]  ;;  %v2932_v30 = vsub.f32 %v2433_v19, %v2442_v37 }
 0x208   :  { %988 = vadd.xlane.f32.xlu1 %v2282_v56 }
 0x21c   :  { %v985_v34 = vpop.xlane.xlu0 %984 }
 0x21d   :  { %v983_v38 = vpop.xlane.xlu1 %982  ;;  %v1004_v60 = vadd.f32 %v985_v34, %v940_v59  ;;  %v832_v59 = vld [vmem:[#allocation3 + $0x8] sm:$0xff] }
 0x21e   :  { %v1003_v26 = vadd.f32 %v983_v38, %v939_v22  ;;  %v840_v34 = vld [vmem:[#allocation3 + $0x48] sm:$0xff] }
 0x21f   :  { %1020 = vst.msk [vmem:[#allocation4 + $0x60] sm:$0xff] %vm34_vm4, %v1004_v60 }
 0x220   :  { %1019 = vst.msk [vmem:[#allocation4 + $0x58] sm:$0xff] %vm34_vm4, %v1003_v26 }
 0x225   :  { %v864_v21 = vpop.xlane.xlu1 %863 }
 0x226   :  { %v895_v56 = vadd.f32 %v864_v21, %v847_v63  ;;  %v675_v63 = vmul.f32 1.442695, %v2929_v16 }
 0x228   :  { %912 = vst.msk [vmem:[#allocation3] sm:$0xff] %vm34_vm4, %v895_v56 }
 0x22e   :  { %v981_v27 = vpop.xlane.xlu2 %980 }
 0x22f   :  { %v1002_v8 = vadd.f32 %v981_v27, %v938_v39  ;;  %v1091_v61 = vld [vmem:[#allocation3] sm:$0xff]  ;;  %v2930_v39 = vsub.f32 %v2516_v29, %v2524_v4  ;;  %v677_v4 = vmul.f32 1.442695, %v2932_v30 }
 0x230   :  { %1330 = vlog2.f32 %v1091_v61 }
 0x231   :  { %1018 = vst.msk [vmem:[#allocation4 + $0x50] sm:$0xff] %vm34_vm4, %v1002_v8  ;;  %1332 = vpow2.f32 %v679_v57  ;;  %v697_v27 = vmul.f32 1.442695, %v2930_v39  ;;  %v2933_v57 = vsub.f32 %v2488_v9, %v2496_v62 }
 0x232   :  { %1334 = vpow2.f32 %v695_v54  ;;  %v699_v54 = vmul.f32 1.442695, %v2934_v6 }
 0x233   :  { %1336 = vpow2.f32 %v687_v32 }
 0x234   :  { %1338 = vpow2.f32 %v673_v1 }
 0x235   :  { %1340 = vpow2.f32 %v689_v23 }
 0x236   :  { %v1331_v55 = vpop.eup %1330  ;;  %1342 = vpow2.f32 %v681_v24 }
 0x237   :  { %v1108_v50 = vmul.f32 0.6931472, %v1331_v55  ;;  %v1333_v0 = vpop.eup %1332  ;;  %v2931_v55 = vsub.f32 %v2461_v25, %v2470_v51  ;;  %v1055_v25 = vld [vmem:[#allocation4 + $0x60] sm:$0xff] }
 0x238   :  { %v1335_v20 = vpop.eup %1334  ;;  %v851_v13 = vmul.f32 %v1333_v0, %v835_v10  ;;  %v844_v10 = vld [vmem:[#allocation3 + $0x68] sm:$0xff] }
 0x239   :  { %v1139_v31 = vsub.f32 %v1075_v42, %v1108_v50  ;;  %v859_v18 = vmul.f32 %v1335_v20, %v843_v47  ;;  %v1337_v17 = vpop.eup %1336  ;;  %v683_v7 = vmul.f32 1.442695, %v2931_v55  ;;  %v1047_v50 = vld [vmem:[#allocation4 + $0x20] sm:$0xff] }
 0x23a   :  { %v1339_v15 = vpop.eup %1338  ;;  %v855_v38 = vmul.f32 %v1337_v17, %v839_v36  ;;  %v1079_v52 = vsub.f32 %v1047_v50, %v1063_v2  ;;  %v1393_v20 = vld [vmem:[%s2793_s0 + $0x20] sm:$0xff] }
 0x23b   :  { %v1155_v35 = vsub.f32 0.0, %v1139_v31  ;;  %v1341_v22 = vpop.eup %1340  ;;  %v848_v60 = vmul.f32 %v1339_v15, %v832_v59  ;;  %vm1175_vm14 = vcmp.lt.s32.totalorder %v1393_v20, 16  ;;  %v1051_v47 = vld [vmem:[#allocation4 + $0x40] sm:$0xff]  ;;  %v1044_v15 = vld [vmem:[#allocation4 + $0x8] sm:$0xff] }
 0x23c   :  { %v856_v40 = vmul.f32 %v1341_v22, %v840_v34  ;;  %v1343_v43 = vpop.eup %1342 }
 0x23d   :  { %v1187_v48 = vsel %vm1171_vm15, %v1155_v35, 0.0  ;;  %v852_v29 = vmul.f32 %v1343_v43, %v836_v53  ;;  %v691_v35 = vmul.f32 1.442695, %v2933_v57 }
 0x23e   :  { %1203 = vst.msk [vmem:[%s2795_s8] sm:$0xff] %vm34_vm4, %v1187_v48  ;;  %v1071_v48 = vld [vmem:[#allocation2 + $0x60] sm:$0xff] }
 0x23f   :  { %v1087_v5 = vsub.f32 %v1055_v25, %v1071_v48 }
 0x245   :  { %v872_v58 = vpop.xlane.xlu0 %871 }
 0x246   :  { %v899_v33 = vadd.f32 %v872_v58, %v851_v13  ;;  %v837_v58 = vld [vmem:[#allocation3 + $0x30] sm:$0xff] }
 0x248   :  { %916 = vst.msk [vmem:[#allocation3 + $0x20] sm:$0xff] %vm34_vm4, %v899_v33  ;;  %v1067_v33 = vld [vmem:[#allocation2 + $0x40] sm:$0xff] }
 0x249   :  { %v1083_v16 = vsub.f32 %v1051_v47, %v1067_v33 }
 0x24b   :  { %v888_v11 = vpop.xlane.xlu1 %887 }
 0x24c   :  { %v907_v45 = vadd.f32 %v888_v11, %v859_v18  ;;  %v1394_v18 = vld [vmem:[%s2793_s0 + $0x60] sm:$0xff] }
 0x24d   :  { %v880_v26 = vpop.xlane.xlu2 %879  ;;  %vm1183_vm7 = vcmp.lt.s32.totalorder %v1394_v18, 16  ;;  %v2935_v11 = vld [vmem:[#allocation5_spill] sm:$0xff] }
 0x24e   :  { %924 = vst.msk [vmem:[#allocation3 + $0x60] sm:$0xff] %vm34_vm4, %v907_v45  ;;  %v866_v14 = vpop.xlane.xlu0 %865  ;;  %v903_v46 = vadd.f32 %v880_v26, %v855_v38  ;;  %v2936_v45 = vld [vmem:[#allocation6_spill] sm:$0xff]  ;;  %v2938_v26 = vld [vmem:[#allocation7_spill] sm:$0xff] }
 0x24f   :  { %v896_v21 = vadd.f32 %v866_v14, %v848_v60  ;;  %v1095_v8 = vld [vmem:[#allocation3 + $0x20] sm:$0xff]  ;;  %v2937_v17 = vsub.f32 %v2935_v11, %v2936_v45  ;;  %v2939_v14 = vld [vmem:[#allocation8_spill] sm:$0xff] }
 0x250   :  { %920 = vst.msk [vmem:[#allocation3 + $0x40] sm:$0xff] %vm34_vm4, %v903_v46  ;;  %1344 = vlog2.f32 %v1095_v8  ;;  %v1060_v8 = vld [vmem:[#allocation2 + $0x8] sm:$0xff] }
 0x251   :  { %913 = vst.msk [vmem:[#allocation3 + $0x8] sm:$0xff] %vm34_vm4, %v896_v21  ;;  %v685_v36 = vmul.f32 1.442695, %v2937_v17 }
 0x253   :  { %v882_v56 = vpop.xlane.xlu1 %881 }
 0x254   :  { %v904_v61 = vadd.f32 %v882_v56, %v856_v40  ;;  %v2940_v40 = vsub.f32 %v2938_v26, %v2939_v14  ;;  %v838_v14 = vld [vmem:[#allocation3 + $0x38] sm:$0xff] }
 0x255   :  { %v1103_v42 = vld [vmem:[#allocation3 + $0x60] sm:$0xff]  ;;  %v874_v31 = vpop.xlane.xlu2 %873 }
 0x256   :  { %1346 = vlog2.f32 %v1103_v42  ;;  %921 = vst.msk [vmem:[#allocation3 + $0x48] sm:$0xff] %vm34_vm4, %v904_v61  ;;  %v900_v51 = vadd.f32 %v874_v31, %v852_v29  ;;  %v1345_v49 = vpop.eup %1344  ;;  %v693_v46 = vmul.f32 1.442695, %v2940_v40  ;;  %v1076_v29 = vsub.f32 %v1044_v15, %v1060_v8 }
 0x257   :  { %1348 = vpow2.f32 %v675_v63  ;;  %v1099_v19 = vld [vmem:[#allocation3 + $0x40] sm:$0xff]  ;;  %v1116_v32 = vmul.f32 0.6931472, %v1345_v49  ;;  %v1052_v63 = vld [vmem:[#allocation4 + $0x48] sm:$0xff] }
 0x258   :  { %1350 = vpow2.f32 %v697_v27  ;;  %v1092_v41 = vld [vmem:[#allocation3 + $0x8] sm:$0xff]  ;;  %917 = vst.msk [vmem:[#allocation3 + $0x28] sm:$0xff] %vm34_vm4, %v900_v51  ;;  %v2941_v51 = vld [vmem:[#allocation9_spill] sm:$0xff] }
 0x259   :  { %1352 = vpow2.f32 %v683_v7  ;;  %v1143_v62 = vsub.f32 %v1079_v52, %v1116_v32  ;;  %v2942_v49 = vsub.f32 %v2941_v51, %v2547_v3  ;;  %v845_v52 = vld [vmem:[#allocation3 + $0x70] sm:$0xff]  ;;  %v1396_v3 = vld [vmem:[%s2793_s0 + $0x8] sm:$0xff] }
 0x25a   :  { %1354 = vpow2.f32 %v677_v4  ;;  %v1068_v4 = vld [vmem:[#allocation2 + $0x48] sm:$0xff]  ;;  %vm1172_vm5 = vcmp.lt.s32.totalorder %v1396_v3, 16  ;;  %v1400_v3 = vld [vmem:[%s2793_s0 + $0x10] sm:$0xff] }
 0x25b   :  { %1356 = vlog2.f32 %v1099_v19  ;;  %v1159_v28 = vsub.f32 0.0, %v1143_v62  ;;  %v701_v2 = vmul.f32 1.442695, %v2942_v49  ;;  %v1084_v57 = vsub.f32 %v1052_v63, %v1068_v4  ;;  %v1048_v32 = vld [vmem:[#allocation4 + $0x28] sm:$0xff] }
 0x25c   :  { %v1347_v37 = vpop.eup %1346  ;;  %1358 = vlog2.f32 %v1092_v41  ;;  %v1064_v62 = vld [vmem:[#allocation2 + $0x28] sm:$0xff]  ;;  %vm1173_vm2 = vcmp.lt.s32.totalorder %v1400_v3, 16 }
 0x25d   :  { %v1349_v1 = vpop.eup %1348  ;;  %v1132_v23 = vmul.f32 0.6931472, %v1347_v37  ;;  %v1100_v0 = vld [vmem:[#allocation3 + $0x48] sm:$0xff]  ;;  %v868_v38 = vpop.xlane.xlu2 %867  ;;  %v1191_v21 = vsel %vm1175_vm14, %v1159_v28, 0.0  ;;  %v1395_v37 = vld [vmem:[%s2793_s0 + $0x40] sm:$0xff] }
 0x25e   :  { %v1351_v9 = vpop.eup %1350  ;;  %1360 = vlog2.f32 %v1100_v0  ;;  %v849_v34 = vmul.f32 %v1349_v1, %v833_v12  ;;  %1207 = vst.msk [vmem:[%s2795_s8 + $0x20] sm:$0xff] %vm34_vm4, %v1191_v21  ;;  %vm1179_vm12 = vcmp.lt.s32.totalorder %v1395_v37, 16 }
 0x25f   :  { %v1353_v44 = vpop.eup %1352  ;;  %1362 = vpow2.f32 %v691_v35  ;;  %v1151_v13 = vsub.f32 %v1087_v5, %v1132_v23  ;;  %v860_v22 = vmul.f32 %v1351_v9, %v844_v10  ;;  %v1096_v55 = vld [vmem:[#allocation3 + $0x28] sm:$0xff]  ;;  %v834_v5 = vld [vmem:[#allocation3 + $0x18] sm:$0xff] }
 0x260   :  { %1364 = vpow2.f32 %v699_v54  ;;  %v2655_v24 = vpop.eup %1354  ;;  %v853_v39 = vmul.f32 %v1353_v44, %v837_v58  ;;  %v897_v53 = vadd.f32 %v868_v38, %v849_v34  ;;  %v841_v54 = vld [vmem:[#allocation3 + $0x50] sm:$0xff]  ;;  %v1397_v23 = vld [vmem:[%s2793_s0 + $0x48] sm:$0xff]  ;;  %v842_v34 = vld [vmem:[#allocation3 + $0x58] sm:$0xff] }
 0x261   :  { %v1167_v59 = vsub.f32 0.0, %v1151_v13  ;;  %v1357_v60 = vpop.eup %1356  ;;  %v890_v56 = vpop.xlane.xlu0 %889  ;;  %1366 = vlog2.f32 %v1096_v55  ;;  %vm1180_vm10 = vcmp.lt.s32.totalorder %v1397_v23, 16  ;;  %v1080_v13 = vsub.f32 %v1048_v32, %v1064_v62  ;;  %v1045_v55 = vld [vmem:[#allocation4 + $0x10] sm:$0xff]  ;;  %v1046_v23 = vld [vmem:[#allocation4 + $0x18] sm:$0xff] }
 0x262   :  { %v1359_v27 = vpop.eup %1358  ;;  %v1124_v43 = vmul.f32 0.6931472, %v1357_v60  ;;  %v908_v7 = vadd.f32 %v890_v56, %v860_v22  ;;  %1368 = vpow2.f32 %v693_v46  ;;  %914 = vst.msk [vmem:[#allocation3 + $0x10] sm:$0xff] %vm34_vm4, %v897_v53  ;;  %v850_v28 = vmul.f32 %v2655_v24, %v834_v5  ;;  %v1398_v60 = vld [vmem:[%s2793_s0 + $0x28] sm:$0xff]  ;;  %v1069_v32 = vld [vmem:[#allocation2 + $0x50] sm:$0xff] }
 0x263   :  { %v1199_v61 = vsel %vm1183_vm7, %v1167_v59, 0.0  ;;  %v876_v42 = vpop.xlane.xlu1 %875  ;;  %v1110_v50 = vmul.f32 0.6931472, %v1359_v27  ;;  %1370 = vpow2.f32 %v685_v36  ;;  %vm1176_vm0 = vcmp.lt.s32.totalorder %v1398_v60, 16  ;;  %v1049_v27 = vld [vmem:[#allocation4 + $0x30] sm:$0xff]  ;;  %v1054_v60 = vld [vmem:[#allocation4 + $0x58] sm:$0xff] }
 0x264   :  { %v1361_v30 = vpop.eup %1360  ;;  %1215 = vst.msk [vmem:[%s2795_s8 + $0x60] sm:$0xff] %vm34_vm4, %v1199_v61  ;;  %v901_v31 = vadd.f32 %v876_v42, %v853_v39  ;;  %v1147_v6 = vsub.f32 %v1083_v16, %v1124_v43  ;;  %1372 = vpow2.f32 %v701_v2  ;;  %v846_v16 = vld [vmem:[#allocation3 + $0x78] sm:$0xff] }
 0x265   :  { %v1363_v25 = vpop.eup %1362  ;;  %v1126_v35 = vmul.f32 0.6931472, %v1361_v30  ;;  %925 = vst.msk [vmem:[#allocation3 + $0x68] sm:$0xff] %vm34_vm4, %v908_v7  ;;  %v1140_v48 = vsub.f32 %v1076_v29, %v1110_v50  ;;  %v892_v20 = vpop.xlane.xlu2 %891  ;;  %v1065_v30 = vld [vmem:[#allocation2 + $0x30] sm:$0xff] }
 0x266   :  { %v1365_v19 = vpop.eup %1364  ;;  %918 = vst.msk [vmem:[#allocation3 + $0x30] sm:$0xff] %vm34_vm4, %v901_v31  ;;  %v1163_v1 = vsub.f32 0.0, %v1147_v6  ;;  %v857_v9 = vmul.f32 %v1363_v25, %v841_v54  ;;  %v1061_v31 = vld [vmem:[#allocation2 + $0x10] sm:$0xff]  ;;  %v1081_v25 = vsub.f32 %v1049_v27, %v1065_v30 }
 0x267   :  { %v1148_v41 = vsub.f32 %v1084_v57, %v1126_v35  ;;  %v1156_v0 = vsub.f32 0.0, %v1140_v48  ;;  %v861_v44 = vmul.f32 %v1365_v19, %v845_v52  ;;  %v1367_v47 = vpop.eup %1366  ;;  %v1077_v2 = vsub.f32 %v1045_v55, %v1061_v31  ;;  %v1053_v35 = vld [vmem:[#allocation4 + $0x50] sm:$0xff]  ;;  %v943_v48 = vld [vmem:[#allocation4 + $0x78] sm:$0xff]  ;;  %v941_v52 = vld [vmem:[#allocation4 + $0x68] sm:$0xff] }
 0x268   :  { %v1195_v12 = vsel %vm1179_vm12, %v1163_v1, 0.0  ;;  %v1118_v11 = vmul.f32 0.6931472, %v1367_v47  ;;  %v1369_v59 = vpop.eup %1368  ;;  %v1399_v54 = vld [vmem:[%s2793_s0 + $0x30] sm:$0xff] }
 0x269   :  { %v1164_v10 = vsub.f32 0.0, %v1148_v41  ;;  %v1188_v58 = vsel %vm1172_vm5, %v1156_v0, 0.0  ;;  %1211 = vst.msk [vmem:[%s2795_s8 + $0x40] sm:$0xff] %vm34_vm4, %v1195_v12  ;;  %v884_v18 = vpop.xlane.xlu0 %883  ;;  %v909_v36 = vadd.f32 %v892_v20, %v861_v44  ;;  %v1371_v38 = vpop.eup %1370  ;;  %v1093_v26 = vld [vmem:[#allocation3 + $0x10] sm:$0xff]  ;;  %v858_v63 = vmul.f32 %v1369_v59, %v842_v34  ;;  %v1062_v12 = vld [vmem:[#allocation2 + $0x18] sm:$0xff] }
 0x26a   :  { %1204 = vst.msk [vmem:[%s2795_s8 + $0x8] sm:$0xff] %vm34_vm4, %v1188_v58  ;;  %v905_v45 = vadd.f32 %v884_v18, %v857_v9  ;;  %v1144_v22 = vsub.f32 %v1080_v13, %v1118_v11  ;;  %v1373_v40 = vpop.eup %1372  ;;  %v854_v56 = vmul.f32 %v1371_v38, %v838_v14  ;;  %vm1177_vm11 = vcmp.lt.s32.totalorder %v1399_v54, 16  ;;  %v942_v1 = vld [vmem:[#allocation4 + $0x70] sm:$0xff]  ;;  %v1402_v38 = vld [vmem:[%s2793_s0 + $0x18] sm:$0xff] }
 0x26b   :  { %v1196_v33 = vsel %vm1180_vm10, %v1164_v10, 0.0  ;;  %v870_v17 = vpop.xlane.xlu1 %869  ;;  %926 = vst.msk [vmem:[#allocation3 + $0x70] sm:$0xff] %vm34_vm4, %v909_v36  ;;  %v862_v61 = vmul.f32 %v1373_v40, %v846_v16  ;;  %v1085_v0 = vsub.f32 %v1053_v35, %v1069_v32  ;;  %v1078_v36 = vsub.f32 %v1046_v23, %v1062_v12  ;;  %v1050_v40 = vld [vmem:[#allocation4 + $0x38] sm:$0xff]  ;;  %v1073_v31 = vld [vmem:[#allocation2 + $0x70] sm:$0xff] }
 0x26c   :  { %1212 = vst.msk [vmem:[%s2795_s8 + $0x48] sm:$0xff] %vm34_vm4, %v1196_v33  ;;  %v898_v15 = vadd.f32 %v870_v17, %v850_v28  ;;  %v1160_v46 = vsub.f32 0.0, %v1144_v22  ;;  %v1104_v28 = vld [vmem:[#allocation3 + $0x68] sm:$0xff]  ;;  %vm1174_vm9 = vcmp.lt.s32.totalorder %v1402_v38, 16  ;;  %v1405_v32 = vld [vmem:[%s2793_s0 + $0x78] sm:$0xff] }
 0x26d   :  { %v1097_v24 = vld [vmem:[#allocation3 + $0x30] sm:$0xff]  ;;  %922 = vst.msk [vmem:[#allocation3 + $0x50] sm:$0xff] %vm34_vm4, %v905_v45  ;;  %vm1186_vm6 = vcmp.lt.s32.totalorder %v1405_v32, 16 }
 0x26e   :  { %1374 = vlog2.f32 %v1097_v24  ;;  %915 = vst.msk [vmem:[#allocation3 + $0x18] sm:$0xff] %vm34_vm4, %v898_v15  ;;  %v1192_v21 = vsel %vm1176_vm0, %v1160_v46, 0.0  ;;  %v1401_v24 = vld [vmem:[%s2793_s0 + $0x50] sm:$0xff] }
 0x26f   :  { %1376 = vlog2.f32 %v1093_v26  ;;  %1208 = vst.msk [vmem:[%s2795_s8 + $0x28] sm:$0xff] %vm34_vm4, %v1192_v21  ;;  %vm1181_vm1 = vcmp.lt.s32.totalorder %v1401_v24, 16 }
 0x270   :  { %v886_v39 = vpop.xlane.xlu2 %885 }
 0x271   :  { %v878_v8 = vpop.xlane.xlu0 %877  ;;  %v906_v43 = vadd.f32 %v886_v39, %v858_v63  ;;  %v1070_v63 = vld [vmem:[#allocation2 + $0x58] sm:$0xff] }
 0x272   :  { %v902_v7 = vadd.f32 %v878_v8, %v854_v56  ;;  %v1105_v37 = vld [vmem:[#allocation3 + $0x70] sm:$0xff]  ;;  %v1066_v39 = vld [vmem:[#allocation2 + $0x38] sm:$0xff]  ;;  %v1086_v27 = vsub.f32 %v1054_v60, %v1070_v63 }
 0x273   :  { %v894_v42 = vpop.xlane.xlu1 %893  ;;  %923 = vst.msk [vmem:[#allocation3 + $0x58] sm:$0xff] %vm34_vm4, %v906_v43  ;;  %v1082_v55 = vsub.f32 %v1050_v40, %v1066_v39 }
 0x274   :  { %v1375_v53 = vpop.eup %1374  ;;  %v1101_v4 = vld [vmem:[#allocation3 + $0x50] sm:$0xff]  ;;  %v910_v29 = vadd.f32 %v894_v42, %v862_v61  ;;  %919 = vst.msk [vmem:[#allocation3 + $0x38] sm:$0xff] %vm34_vm4, %v902_v7 }
 0x275   :  { %v1377_v50 = vpop.eup %1376  ;;  %v1120_v51 = vmul.f32 0.6931472, %v1375_v53  ;;  %1378 = vlog2.f32 %v1101_v4  ;;  %v1094_v49 = vld [vmem:[#allocation3 + $0x18] sm:$0xff] }
 0x276   :  { %v1112_v57 = vmul.f32 0.6931472, %v1377_v50  ;;  %1380 = vlog2.f32 %v1094_v49  ;;  %927 = vst.msk [vmem:[#allocation3 + $0x78] sm:$0xff] %vm34_vm4, %v910_v29  ;;  %v1074_v53 = vld [vmem:[#allocation2 + $0x78] sm:$0xff] }
 0x277   :  { %v1145_v6 = vsub.f32 %v1081_v25, %v1120_v51  ;;  %1382 = vlog2.f32 %v1105_v37  ;;  %v1403_v50 = vld [vmem:[%s2793_s0 + $0x58] sm:$0xff] }
 0x278   :  { %v1141_v19 = vsub.f32 %v1077_v2, %v1112_v57  ;;  %v987_v5 = vpop.xlane.xlu2 %986  ;;  %vm1182_vm3 = vcmp.lt.s32.totalorder %v1403_v50, 16  ;;  %v1404_v2 = vld [vmem:[%s2793_s0 + $0x38] sm:$0xff]  ;;  %v1072_v57 = vld [vmem:[#allocation2 + $0x68] sm:$0xff] }
 0x279   :  { %v1161_v41 = vsub.f32 0.0, %v1145_v6  ;;  %v991_v62 = vpop.xlane.xlu0 %990  ;;  %v1005_v58 = vadd.f32 %v987_v5, %v941_v52  ;;  %vm1178_vm13 = vcmp.lt.s32.totalorder %v1404_v2, 16  ;;  %v1406_v5 = vld [vmem:[%s2793_s0 + $0x70] sm:$0xff] }
 0x27a   :  { %v1157_v9 = vsub.f32 0.0, %v1141_v19  ;;  %v1102_v20 = vld [vmem:[#allocation3 + $0x58] sm:$0xff]  ;;  %v1007_v47 = vadd.f32 %v991_v62, %v943_v48  ;;  %vm1185_vm8 = vcmp.lt.s32.totalorder %v1406_v5, 16  ;;  %v1407_v62 = vld [vmem:[%s2793_s0 + $0x68] sm:$0xff] }
 0x27b   :  { %v1379_v10 = vpop.eup %1378  ;;  %v1193_v44 = vsel %vm1177_vm11, %v1161_v41, 0.0  ;;  %v989_v13 = vpop.xlane.xlu1 %988  ;;  %v1098_v45 = vld [vmem:[#allocation3 + $0x38] sm:$0xff]  ;;  %1384 = vlog2.f32 %v1102_v20  ;;  %1021 = vst.msk [vmem:[#allocation4 + $0x68] sm:$0xff] %vm34_vm4, %v1005_v58  ;;  %vm1184_vm15 = vcmp.lt.s32.totalorder %v1407_v62, 16 }
 0x27c   :  { %v1381_v18 = vpop.eup %1380  ;;  %1209 = vst.msk [vmem:[%s2795_s8 + $0x30] sm:$0xff] %vm34_vm4, %v1193_v44  ;;  %v1189_v33 = vsel %vm1173_vm2, %v1157_v9, 0.0  ;;  %v1128_v11 = vmul.f32 0.6931472, %v1379_v10  ;;  %v1006_v17 = vadd.f32 %v989_v13, %v942_v1  ;;  %1386 = vlog2.f32 %v1098_v45 }
 0x27d   :  { %1205 = vst.msk [vmem:[%s2795_s8 + $0x10] sm:$0xff] %vm34_vm4, %v1189_v33  ;;  %v1114_v15 = vmul.f32 0.6931472, %v1381_v18  ;;  %v1106_v59 = vld [vmem:[#allocation3 + $0x78] sm:$0xff]  ;;  %v1383_v14 = vpop.eup %1382 }
 0x27e   :  { %v1149_v22 = vsub.f32 %v1085_v0, %v1128_v11  ;;  %1388 = vlog2.f32 %v1106_v59  ;;  %1023 = vst.msk [vmem:[#allocation4 + $0x78] sm:$0xff] %vm34_vm4, %v1007_v47  ;;  %v1136_v35 = vmul.f32 0.6931472, %v1383_v14 }
 0x27f   :  { %1390 = vlog2.f32 %v1104_v28  ;;  %v1142_v34 = vsub.f32 %v1078_v36, %v1114_v15  ;;  %1022 = vst.msk [vmem:[#allocation4 + $0x70] sm:$0xff] %vm34_vm4, %v1006_v17 }
 0x280   :  { %v1165_v26 = vsub.f32 0.0, %v1149_v22 }
 0x281   :  { %v1158_v46 = vsub.f32 0.0, %v1142_v34  ;;  %v1385_v16 = vpop.eup %1384 }
 0x282   :  { %v1197_v21 = vsel %vm1181_vm1, %v1165_v26, 0.0  ;;  %v1387_v56 = vpop.eup %1386  ;;  %v1130_v61 = vmul.f32 0.6931472, %v1385_v16  ;;  %v1056_v19 = vld [vmem:[#allocation4 + $0x68] sm:$0xff] }
 0x283   :  { %1213 = vst.msk [vmem:[%s2795_s8 + $0x50] sm:$0xff] %vm34_vm4, %v1197_v21  ;;  %v1190_v8 = vsel %vm1174_vm9, %v1158_v46, 0.0  ;;  %v1122_v7 = vmul.f32 0.6931472, %v1387_v56  ;;  %v1088_v3 = vsub.f32 %v1056_v19, %v1072_v57 }
 0x284   :  { %v1389_v43 = vpop.eup %1388  ;;  %1206 = vst.msk [vmem:[%s2795_s8 + $0x18] sm:$0xff] %vm34_vm4, %v1190_v8  ;;  %v1150_v4 = vsub.f32 %v1086_v27, %v1130_v61 }
 0x285   :  { %v1391_v42 = vpop.eup %1390  ;;  %v1138_v30 = vmul.f32 0.6931472, %v1389_v43  ;;  %v1058_v29 = vld [vmem:[#allocation4 + $0x78] sm:$0xff]  ;;  %v1146_v25 = vsub.f32 %v1082_v55, %v1122_v7 }
 0x286   :  { %v1090_v51 = vsub.f32 %v1058_v29, %v1074_v53  ;;  %v1057_v49 = vld [vmem:[#allocation4 + $0x70] sm:$0xff]  ;;  %v1166_v6 = vsub.f32 0.0, %v1150_v4  ;;  %v1134_v37 = vmul.f32 0.6931472, %v1391_v42 }
 0x287   :  { %v1089_v54 = vsub.f32 %v1057_v49, %v1073_v31  ;;  %v1162_v48 = vsub.f32 0.0, %v1146_v25 }
 0x288   :  { %v1154_v52 = vsub.f32 %v1090_v51, %v1138_v30  ;;  %v1198_v41 = vsel %vm1182_vm3, %v1166_v6, 0.0  ;;  %v1152_v9 = vsub.f32 %v1088_v3, %v1134_v37 }
 0x289   :  { %v1153_v1 = vsub.f32 %v1089_v54, %v1136_v35  ;;  %v1194_v23 = vsel %vm1178_vm13, %v1162_v48, 0.0  ;;  %1214 = vst.msk [vmem:[%s2795_s8 + $0x58] sm:$0xff] %vm34_vm4, %v1198_v41 }
 0x28a   :  { %v1170_v0 = vsub.f32 0.0, %v1154_v52  ;;  %1210 = vst.msk [vmem:[%s2795_s8 + $0x38] sm:$0xff] %vm34_vm4, %v1194_v23  ;;  %v1168_v44 = vsub.f32 0.0, %v1152_v9 }
 0x28b   :  { %v1169_v10 = vsub.f32 0.0, %v1153_v1 }
 0x28c   :  { %v1202_v12 = vsel %vm1186_vm6, %v1170_v0, 0.0  ;;  %v1200_v47 = vsel %vm1184_vm15, %v1168_v44, 0.0 }
 0x28d   :  { %1218 = vst.msk [vmem:[%s2795_s8 + $0x78] sm:$0xff] %vm34_vm4, %v1202_v12  ;;  %v1201_v20 = vsel %vm1185_vm8, %v1169_v10, 0.0 }
 0x28e   :  { %1217 = vst.msk [vmem:[%s2795_s8 + $0x70] sm:$0xff] %vm34_vm4, %v1201_v20 }
 0x28f   :  { %1216 = vst.msk [vmem:[%s2795_s8 + $0x68] sm:$0xff] %vm34_vm4, %v1200_v47 }

</bundles_post_ra>
